<compile_context>
chip_gen: v7x
topology: tpu7x:2x2x1
jax: 0.10.0
libtpu: 0.0.40
codegen_flags: <defaults>
</compile_context>

<pallas_src>
import functools
import math

import jax
import jax.numpy as jnp
from jax.experimental import pallas as pl
from jax.experimental.pallas import tpu as pltpu


def _layer_norm(y, g, b, eps=1e-6):
    mu = jnp.mean(y, axis=-1, keepdims=True)
    var = jnp.mean(jnp.square(y - mu), axis=-1, keepdims=True)
    return (y - mu) * jax.lax.rsqrt(var + eps) * g + b


def _encoder_kernel(
    # inputs
    x_full_ref,            # (1, S, E)   full sequence (K/V path)
    x_tile_ref,            # (1, TQ, E)  current query tile (Q / residual path)
    wq_ref, bq_ref,        # (E, E), (1, E)
    wkv_ref, bkv_ref,      # (E, 2E), (1, 2E)   packed [K | V]
    wo3_ref, bo_ref,       # (NH, hd, E), (1, E) out-proj, reshaped per head
    g1_ref, b1_ref,        # (1, E) layernorm1 gamma/beta
    g2_ref, b2_ref,        # (1, E) layernorm2 gamma/beta
    wff1_ref, bff1_ref,    # (E, 2E), (1, 2E)
    wff2_ref, bff2_ref,    # (2E, E), (1, E)
    # output
    o_ref,                 # (1, TQ, E)
    # scratch (persists across the query-tile grid axis)
    k_s, v_s,              # (NH, S, hd) f32
    qh_s,                  # (NH, TQ, hd) f32
    *, num_heads, head_dim,
):
    E = num_heads * head_dim
    scale = 1.0 / math.sqrt(head_dim)

    # ---- Once per batch element: project K/V for the whole sequence into
    #      per-head scratch (fused (S,E) x (E,2E) MXU pass). ----
    @pl.when(pl.program_id(1) == 0)
    def _build_kv():
        xn_full = _layer_norm(x_full_ref[0], g1_ref[...], b1_ref[...])     # (S, E)
        kv = jnp.dot(xn_full, wkv_ref[...],
                     preferred_element_type=jnp.float32) + bkv_ref[...]    # (S, 2E)
        for h in range(num_heads):
            lo = h * head_dim
            k_s[h] = kv[:, lo:lo + head_dim]
            v_s[h] = kv[:, E + lo:E + lo + head_dim]

    # ---- Per query tile ----
    x_t = x_tile_ref[0]                                                    # (TQ, E)
    xn_t = _layer_norm(x_t, g1_ref[...], b1_ref[...])
    q_t = jnp.dot(xn_t, wq_ref[...],
                  preferred_element_type=jnp.float32) + bq_ref[...]        # (TQ, E)
    q_t = q_t * scale                                                      # fold 1/sqrt(hd)
    for h in range(num_heads):
        lo = h * head_dim
        qh_s[h] = q_t[:, lo:lo + head_dim]

    # Head-batched attention: one batched MXU pass per einsum.
    s = jnp.einsum("hqd,hkd->hqk", qh_s[...], k_s[...],
                   preferred_element_type=jnp.float32)                     # (NH, TQ, S)
    s = s - jnp.max(s, axis=-1, keepdims=True)
    p = jnp.exp(s)
    denom = jnp.sum(p, axis=-1, keepdims=True)
    p = p * pl.reciprocal(denom, approx=True)                              # EUP divide
    ctx = jnp.einsum("hqk,hkd->hqd", p, v_s[...],
                     preferred_element_type=jnp.float32)                   # (NH, TQ, hd)

    # Output projection per head (wo reshaped to (NH, hd, E) on the host),
    # then reduce over heads -> no in-kernel head-merge reshape/concat.
    proj = jnp.einsum("hqd,hde->hqe", ctx, wo3_ref[...],
                      preferred_element_type=jnp.float32)                  # (NH, TQ, E)
    attn = jnp.sum(proj, axis=0) + bo_ref[...]                             # (TQ, E)

    # ---- Residual 1, LayerNorm 2, FFN, Residual 2 ----
    x1 = x_t + attn
    xn2 = _layer_norm(x1, g2_ref[...], b2_ref[...])
    h1 = jnp.dot(xn2, wff1_ref[...],
                 preferred_element_type=jnp.float32) + bff1_ref[...]
    h1 = jnp.maximum(h1, 0.0)
    ff = jnp.dot(h1, wff2_ref[...],
                 preferred_element_type=jnp.float32) + bff2_ref[...]

    o_ref[0] = (x1 + ff).astype(o_ref.dtype)


def _vmem_limit_bytes(S, E, q_tile, num_heads, head_dim):
    """Conservative VMEM budget (f32); capped at 64 MiB so it is v7x-safe."""
    f32 = 4
    weights = (E * E + E) + (E * 2 * E + 2 * E) + (num_heads * head_dim * E + E) \
        + 4 * E + (E * 2 * E + 2 * E) + (2 * E * E + E)
    acts = S * E + 2 * (2 * q_tile * E)                   # x_full + x_tile/out (dbl buf)
    scratch = num_heads * head_dim * (2 * S + q_tile)     # k_s, v_s, qh_s
    live = 3 * num_heads * q_tile * S + num_heads * q_tile * E \
        + 6 * q_tile * E + 2 * q_tile * 2 * E
    est = f32 * (2 * weights + acts + scratch + live) + (8 << 20)
    return int(max(32 << 20, min(est, 64 << 20)))


def transformer_encoder_block(x, params, num_heads, q_tile=None):
    """x: [B, S, E] float32. params: dict of weight arrays (see init_params)."""
    B, S, E = x.shape
    head_dim = E // num_heads
    H = 2 * E
    if q_tile is None:
        q_tile = S if S <= 256 else 256
    assert S % q_tile == 0, "seq_len must be divisible by q_tile"
    n_q = S // q_tile

    # Host-side weight packing (pure layout, done once per call).
    wkv = jnp.concatenate([params["wk"], params["wv"]], axis=1)      # (E, 2E)
    bkv = jnp.concatenate([params["bk"], params["bv"]], axis=1)      # (1, 2E)
    wo3 = params["wo"].reshape(num_heads, head_dim, E)               # (NH, hd, E)

    kernel = functools.partial(_encoder_kernel,
                               num_heads=num_heads, head_dim=head_dim)

    def const(shape):
        return pl.BlockSpec(shape, lambda b, qi, _n=len(shape): (0,) * _n)

    in_specs = [
        pl.BlockSpec((1, S, E), lambda b, qi: (b, 0, 0)),        # x_full (fetched once/b)
        pl.BlockSpec((1, q_tile, E), lambda b, qi: (b, qi, 0)),  # x_tile
        const((E, E)), const((1, E)),                            # wq, bq
        const((E, 2 * E)), const((1, 2 * E)),                    # wkv, bkv
        const((num_heads, head_dim, E)), const((1, E)),          # wo3, bo
        const((1, E)), const((1, E)),                            # g1, b1
        const((1, E)), const((1, E)),                            # g2, b2
        const((E, H)), const((1, H)),                            # wff1, bff1
        const((H, E)), const((1, E)),                            # wff2, bff2
    ]

    return pl.pallas_call(
        kernel,
        out_shape=jax.ShapeDtypeStruct((B, S, E), x.dtype),
        grid_spec=pltpu.PrefetchScalarGridSpec(
            num_scalar_prefetch=0,
            grid=(B, n_q),
            in_specs=in_specs,
            out_specs=pl.BlockSpec((1, q_tile, E), lambda b, qi: (b, qi, 0)),
            scratch_shapes=[
                pltpu.VMEM((num_heads, S, head_dim), jnp.float32),       # k_s
                pltpu.VMEM((num_heads, S, head_dim), jnp.float32),       # v_s
                pltpu.VMEM((num_heads, q_tile, head_dim), jnp.float32),  # qh_s
            ]),
        compiler_params=pltpu.CompilerParams(
            dimension_semantics=("parallel", "arbitrary"),
            vmem_limit_bytes=_vmem_limit_bytes(S, E, q_tile, num_heads, head_dim)),
    )(
        x, x,
        params["wq"], params["bq"],
        wkv, bkv,
        wo3, params["bo"],
        params["g1"], params["b1"],
        params["g2"], params["b2"],
        params["wff1"], params["bff1"],
        params["wff2"], params["bff2"],
    )


def init_params(key, embed_dim):
    """Deterministic synthetic parameters matching nn.MultiheadAttention /
    LayerNorm / FFN shapes. Projection weights are stored transposed
    (in_features, out_features) so the kernel can right-multiply."""
    E, H = embed_dim, 2 * embed_dim
    ks = jax.random.split(key, 8)
    s = 0.1
    return {
        "wq": s * jax.random.normal(ks[0], (E, E), jnp.float32),
        "wk": s * jax.random.normal(ks[1], (E, E), jnp.float32),
        "wv": s * jax.random.normal(ks[2], (E, E), jnp.float32),
        "bq": s * jax.random.normal(ks[3], (1, E), jnp.float32),
        "bk": jnp.zeros((1, E), jnp.float32),
        "bv": jnp.zeros((1, E), jnp.float32),
        "wo": s * jax.random.normal(ks[4], (E, E), jnp.float32),
        "bo": jnp.zeros((1, E), jnp.float32),
        "g1": jnp.ones((1, E), jnp.float32),
        "b1": jnp.zeros((1, E), jnp.float32),
        "g2": jnp.ones((1, E), jnp.float32),
        "b2": jnp.zeros((1, E), jnp.float32),
        "wff1": s * jax.random.normal(ks[5], (E, H), jnp.float32),
        "bff1": s * jax.random.normal(ks[6], (1, H), jnp.float32),
        "wff2": s * jax.random.normal(ks[7], (H, E), jnp.float32),
        "bff2": jnp.zeros((1, E), jnp.float32),
    }


def _reference(x, p, num_heads):
    """Pure-JAX reference mirroring the PyTorch forward (eval mode)."""
    B, S, E = x.shape
    hd = E // num_heads

    def ln(y, g, b):
        mu = jnp.mean(y, -1, keepdims=True)
        var = jnp.mean((y - mu) ** 2, -1, keepdims=True)
        return (y - mu) / jnp.sqrt(var + 1e-6) * g + b

    xn = ln(x, p["g1"], p["b1"])
    q = xn @ p["wq"] + p["bq"]
    k = xn @ p["wk"] + p["bk"]
    v = xn @ p["wv"] + p["bv"]
    q = q.reshape(B, S, num_heads, hd).transpose(0, 2, 1, 3)
    k = k.reshape(B, S, num_heads, hd).transpose(0, 2, 1, 3)
    v = v.reshape(B, S, num_heads, hd).transpose(0, 2, 1, 3)
    s = jnp.einsum("bhqd,bhkd->bhqk", q, k) / math.sqrt(hd)
    a = jax.nn.softmax(s, axis=-1)
    o = jnp.einsum("bhqk,bhkd->bhqd", a, v).transpose(0, 2, 1, 3).reshape(B, S, E)
    o = o @ p["wo"] + p["bo"]
    x1 = x + o
    xn2 = ln(x1, p["g2"], p["b2"])
    ff = jnp.maximum(xn2 @ p["wff1"] + p["bff1"], 0.0) @ p["wff2"] + p["bff2"]
    return x1 + ff


def _check(B, S, E, NH, seed, q_tile=None):
    key = jax.random.PRNGKey(seed)
    kx, kp = jax.random.split(key)
    x = jax.random.normal(kx, (B, S, E), jnp.float32)
    params = init_params(kp, E)

    out = transformer_encoder_block(x, params, NH, q_tile=q_tile)
    out = jax.block_until_ready(out)

    ref = _reference(x, params, NH)
    assert out.shape == (B, S, E)
    # Tolerance slightly looser than pure-f32 because the softmax denominator
    # uses the EUP approximate reciprocal.
    assert jnp.allclose(out, ref, atol=5e-3, rtol=5e-3), \
        f"mismatch: max abs err {jnp.max(jnp.abs(out - ref))}"


if __name__ == "__main__":
    # Small shape consistent with the module (batch=2, seq=8, embed=32, heads=4).
    _check(B=2, S=8, E=32, NH=4, seed=0)
    # Lane-dense config exercising the seq-tiled path (grid = (2, 2)).
    _check(B=2, S=16, E=128, NH=4, seed=1, q_tile=8)
    print("KERNEL_OK")
</pallas_src>

<mosaic_0001>
module attributes {stable_mosaic.version = 11 : i64} {
  func.func @_encoder_kernel(%arg0: i32, %arg1: i32, %arg2: memref<1x8x32xf32, #tpu.memory_space<vmem>>, %arg3: memref<1x8x32xf32, #tpu.memory_space<vmem>>, %arg4: memref<32x32xf32, #tpu.memory_space<vmem>>, %arg5: memref<1x32xf32, #tpu.memory_space<vmem>>, %arg6: memref<32x64xf32, #tpu.memory_space<vmem>>, %arg7: memref<1x64xf32, #tpu.memory_space<vmem>>, %arg8: memref<4x8x32xf32, #tpu.memory_space<vmem>>, %arg9: memref<1x32xf32, #tpu.memory_space<vmem>>, %arg10: memref<1x32xf32, #tpu.memory_space<vmem>>, %arg11: memref<1x32xf32, #tpu.memory_space<vmem>>, %arg12: memref<1x32xf32, #tpu.memory_space<vmem>>, %arg13: memref<1x32xf32, #tpu.memory_space<vmem>>, %arg14: memref<32x64xf32, #tpu.memory_space<vmem>>, %arg15: memref<1x64xf32, #tpu.memory_space<vmem>>, %arg16: memref<64x32xf32, #tpu.memory_space<vmem>>, %arg17: memref<1x32xf32, #tpu.memory_space<vmem>>, %arg18: memref<1x8x32xf32, #tpu.memory_space<vmem>>, %arg19: memref<4x8x8xf32, #tpu.memory_space<vmem>>, %arg20: memref<4x8x8xf32, #tpu.memory_space<vmem>>, %arg21: memref<4x8x8xf32, #tpu.memory_space<vmem>>) attributes {dimension_semantics = [#tpu.dimension_semantics<parallel>, #tpu.dimension_semantics<arbitrary>], iteration_bounds = array<i64: 2, 1>, scalar_prefetch = 0 : i64, scratch_operands = 3 : i64, tpu.core_type = #tpu.core_type<tc>, window_params = [{transform_indices = @transform_0, window_bounds = array<i64: 1, 8, 32>}, {transform_indices = @transform_1, window_bounds = array<i64: 1, 8, 32>}, {pipeline_mode = #tpu.pipeline_mode<synchronous>, transform_indices = @transform_2, window_bounds = array<i64: 32, 32>}, {pipeline_mode = #tpu.pipeline_mode<synchronous>, transform_indices = @transform_3, window_bounds = array<i64: 1, 32>}, {pipeline_mode = #tpu.pipeline_mode<synchronous>, transform_indices = @transform_4, window_bounds = array<i64: 32, 64>}, {pipeline_mode = #tpu.pipeline_mode<synchronous>, transform_indices = @transform_5, window_bounds = array<i64: 1, 64>}, {pipeline_mode = #tpu.pipeline_mode<synchronous>, transform_indices = @transform_6, window_bounds = array<i64: 4, 8, 32>}, {pipeline_mode = #tpu.pipeline_mode<synchronous>, transform_indices = @transform_7, window_bounds = array<i64: 1, 32>}, {pipeline_mode = #tpu.pipeline_mode<synchronous>, transform_indices = @transform_8, window_bounds = array<i64: 1, 32>}, {pipeline_mode = #tpu.pipeline_mode<synchronous>, transform_indices = @transform_9, window_bounds = array<i64: 1, 32>}, {pipeline_mode = #tpu.pipeline_mode<synchronous>, transform_indices = @transform_10, window_bounds = array<i64: 1, 32>}, {pipeline_mode = #tpu.pipeline_mode<synchronous>, transform_indices = @transform_11, window_bounds = array<i64: 1, 32>}, {pipeline_mode = #tpu.pipeline_mode<synchronous>, transform_indices = @transform_12, window_bounds = array<i64: 32, 64>}, {pipeline_mode = #tpu.pipeline_mode<synchronous>, transform_indices = @transform_13, window_bounds = array<i64: 1, 64>}, {pipeline_mode = #tpu.pipeline_mode<synchronous>, transform_indices = @transform_14, window_bounds = array<i64: 64, 32>}, {pipeline_mode = #tpu.pipeline_mode<synchronous>, transform_indices = @transform_15, window_bounds = array<i64: 1, 32>}, {transform_indices = @transform_16, window_bounds = array<i64: 1, 8, 32>}]} {
    %c0_i32 = arith.constant 0 : i32
    %0 = arith.cmpi eq, %arg1, %c0_i32 : i32
    %1 = arith.extui %0 : i1 to i32
    %c0_i32_0 = arith.constant 0 : i32
    %2 = arith.cmpi ne, %1, %c0_i32_0 : i32
    scf.if %2 {
      %c0_69 = arith.constant 0 : index
      %c0_70 = arith.constant 0 : index
      %c0_71 = arith.constant 0 : index
      %114 = vector.load %arg2[%c0_69, %c0_70, %c0_71] : memref<1x8x32xf32, #tpu.memory_space<vmem>>, vector<1x8x32xf32>
      %115 = vector.shape_cast %114 : vector<1x8x32xf32> to vector<8x32xf32>
      %c0_72 = arith.constant 0 : index
      %c0_73 = arith.constant 0 : index
      %116 = vector.load %arg10[%c0_72, %c0_73] : memref<1x32xf32, #tpu.memory_space<vmem>>, vector<1x32xf32>
      %c0_74 = arith.constant 0 : index
      %c0_75 = arith.constant 0 : index
      %117 = vector.load %arg11[%c0_74, %c0_75] : memref<1x32xf32, #tpu.memory_space<vmem>>, vector<1x32xf32>
      %cst_76 = arith.constant dense<0.000000e+00> : vector<8xf32>
      %118 = vector.multi_reduction <add>, %115, %cst_76 [1] : vector<8x32xf32> to vector<8xf32>
      %119 = vector.shape_cast %118 : vector<8xf32> to vector<8x1xf32>
      %cst_77 = arith.constant 3.200000e+01 : f32
      %120 = vector.broadcast %cst_77 : f32 to vector<8x1xf32>
      %121 = arith.divf %119, %120 : vector<8x1xf32>
      %122 = vector.broadcast %121 : vector<8x1xf32> to vector<8x32xf32>
      %123 = arith.subf %115, %122 : vector<8x32xf32>
      %124 = arith.mulf %123, %123 : vector<8x32xf32>
      %cst_78 = arith.constant dense<0.000000e+00> : vector<8xf32>
      %125 = vector.multi_reduction <add>, %124, %cst_78 [1] : vector<8x32xf32> to vector<8xf32>
      %126 = vector.shape_cast %125 : vector<8xf32> to vector<8x1xf32>
      %cst_79 = arith.constant 3.200000e+01 : f32
      %127 = vector.broadcast %cst_79 : f32 to vector<8x1xf32>
      %128 = arith.divf %126, %127 : vector<8x1xf32>
      %129 = vector.broadcast %121 : vector<8x1xf32> to vector<8x32xf32>
      %130 = arith.subf %115, %129 : vector<8x32xf32>
      %cst_80 = arith.constant 9.99999997E-7 : f32
      %131 = vector.broadcast %cst_80 : f32 to vector<8x1xf32>
      %132 = arith.addf %128, %131 : vector<8x1xf32>
      %133 = math.rsqrt %132 : vector<8x1xf32>
      %134 = vector.broadcast %133 : vector<8x1xf32> to vector<8x32xf32>
      %135 = arith.mulf %130, %134 : vector<8x32xf32>
      %136 = vector.broadcast %116 : vector<1x32xf32> to vector<8x32xf32>
      %137 = arith.mulf %135, %136 : vector<8x32xf32>
      %138 = vector.broadcast %117 : vector<1x32xf32> to vector<8x32xf32>
      %139 = arith.addf %137, %138 : vector<8x32xf32>
      %c0_81 = arith.constant 0 : index
      %c0_82 = arith.constant 0 : index
      %140 = vector.load %arg6[%c0_81, %c0_82] : memref<32x64xf32, #tpu.memory_space<vmem>>, vector<32x64xf32>
      %cst_83 = arith.constant dense<0.000000e+00> : vector<8x64xf32>
      %141 = tpu.matmul %139, %140, %cst_83 {dimension_numbers = #tpu.dot_dimension_numbers<[1], [0], [0], [1], [0, 0, 1, 1], [], []>} : vector<8x32xf32>, vector<32x64xf32>, vector<8x64xf32> -> vector<8x64xf32>
      %c0_84 = arith.constant 0 : index
      %c0_85 = arith.constant 0 : index
      %142 = vector.load %arg7[%c0_84, %c0_85] : memref<1x64xf32, #tpu.memory_space<vmem>>, vector<1x64xf32>
      %143 = vector.broadcast %142 : vector<1x64xf32> to vector<8x64xf32>
      %144 = arith.addf %141, %143 : vector<8x64xf32>
      %145 = vector.extract_strided_slice %144 {offsets = [0, 0], sizes = [8, 8], strides = [1, 1]} : vector<8x64xf32> to vector<8x8xf32>
      %c0_86 = arith.constant 0 : index
      %c0_87 = arith.constant 0 : index
      %c0_88 = arith.constant 0 : index
      %146 = vector.load %arg19[%c0_86, %c0_87, %c0_88] : memref<4x8x8xf32, #tpu.memory_space<vmem>>, vector<1x8x8xf32>
      %147 = vector.shape_cast %146 : vector<1x8x8xf32> to vector<8x8xf32>
      %148 = vector.shape_cast %145 : vector<8x8xf32> to vector<1x8x8xf32>
      tpu.vector_store %arg19[%c0_86, %c0_87, %c0_88], %148 {strides = array<i32>} : memref<4x8x8xf32, #tpu.memory_space<vmem>>, vector<1x8x8xf32>,
      %149 = vector.extract_strided_slice %144 {offsets = [0, 32], sizes = [8, 8], strides = [1, 1]} : vector<8x64xf32> to vector<8x8xf32>
      %c0_89 = arith.constant 0 : index
      %c0_90 = arith.constant 0 : index
      %c0_91 = arith.constant 0 : index
      %150 = vector.load %arg20[%c0_89, %c0_90, %c0_91] : memref<4x8x8xf32, #tpu.memory_space<vmem>>, vector<1x8x8xf32>
      %151 = vector.shape_cast %150 : vector<1x8x8xf32> to vector<8x8xf32>
      %152 = vector.shape_cast %149 : vector<8x8xf32> to vector<1x8x8xf32>
      tpu.vector_store %arg20[%c0_89, %c0_90, %c0_91], %152 {strides = array<i32>} : memref<4x8x8xf32, #tpu.memory_space<vmem>>, vector<1x8x8xf32>,
      %153 = vector.extract_strided_slice %144 {offsets = [0, 8], sizes = [8, 8], strides = [1, 1]} : vector<8x64xf32> to vector<8x8xf32>
      %c1_92 = arith.constant 1 : index
      %c0_93 = arith.constant 0 : index
      %c0_94 = arith.constant 0 : index
      %154 = vector.load %arg19[%c1_92, %c0_93, %c0_94] : memref<4x8x8xf32, #tpu.memory_space<vmem>>, vector<1x8x8xf32>
      %155 = vector.shape_cast %154 : vector<1x8x8xf32> to vector<8x8xf32>
      %156 = vector.shape_cast %153 : vector<8x8xf32> to vector<1x8x8xf32>
      tpu.vector_store %arg19[%c1_92, %c0_93, %c0_94], %156 {strides = array<i32>} : memref<4x8x8xf32, #tpu.memory_space<vmem>>, vector<1x8x8xf32>,
      %157 = vector.extract_strided_slice %144 {offsets = [0, 40], sizes = [8, 8], strides = [1, 1]} : vector<8x64xf32> to vector<8x8xf32>
      %c1_95 = arith.constant 1 : index
      %c0_96 = arith.constant 0 : index
      %c0_97 = arith.constant 0 : index
      %158 = vector.load %arg20[%c1_95, %c0_96, %c0_97] : memref<4x8x8xf32, #tpu.memory_space<vmem>>, vector<1x8x8xf32>
      %159 = vector.shape_cast %158 : vector<1x8x8xf32> to vector<8x8xf32>
      %160 = vector.shape_cast %157 : vector<8x8xf32> to vector<1x8x8xf32>
      tpu.vector_store %arg20[%c1_95, %c0_96, %c0_97], %160 {strides = array<i32>} : memref<4x8x8xf32, #tpu.memory_space<vmem>>, vector<1x8x8xf32>,
      %161 = vector.extract_strided_slice %144 {offsets = [0, 16], sizes = [8, 8], strides = [1, 1]} : vector<8x64xf32> to vector<8x8xf32>
      %c2_98 = arith.constant 2 : index
      %c0_99 = arith.constant 0 : index
      %c0_100 = arith.constant 0 : index
      %162 = vector.load %arg19[%c2_98, %c0_99, %c0_100] : memref<4x8x8xf32, #tpu.memory_space<vmem>>, vector<1x8x8xf32>
      %163 = vector.shape_cast %162 : vector<1x8x8xf32> to vector<8x8xf32>
      %164 = vector.shape_cast %161 : vector<8x8xf32> to vector<1x8x8xf32>
      tpu.vector_store %arg19[%c2_98, %c0_99, %c0_100], %164 {strides = array<i32>} : memref<4x8x8xf32, #tpu.memory_space<vmem>>, vector<1x8x8xf32>,
      %165 = vector.extract_strided_slice %144 {offsets = [0, 48], sizes = [8, 8], strides = [1, 1]} : vector<8x64xf32> to vector<8x8xf32>
      %c2_101 = arith.constant 2 : index
      %c0_102 = arith.constant 0 : index
      %c0_103 = arith.constant 0 : index
      %166 = vector.load %arg20[%c2_101, %c0_102, %c0_103] : memref<4x8x8xf32, #tpu.memory_space<vmem>>, vector<1x8x8xf32>
      %167 = vector.shape_cast %166 : vector<1x8x8xf32> to vector<8x8xf32>
      %168 = vector.shape_cast %165 : vector<8x8xf32> to vector<1x8x8xf32>
      tpu.vector_store %arg20[%c2_101, %c0_102, %c0_103], %168 {strides = array<i32>} : memref<4x8x8xf32, #tpu.memory_space<vmem>>, vector<1x8x8xf32>,
      %169 = vector.extract_strided_slice %144 {offsets = [0, 24], sizes = [8, 8], strides = [1, 1]} : vector<8x64xf32> to vector<8x8xf32>
      %c3_104 = arith.constant 3 : index
      %c0_105 = arith.constant 0 : index
      %c0_106 = arith.constant 0 : index
      %170 = vector.load %arg19[%c3_104, %c0_105, %c0_106] : memref<4x8x8xf32, #tpu.memory_space<vmem>>, vector<1x8x8xf32>
      %171 = vector.shape_cast %170 : vector<1x8x8xf32> to vector<8x8xf32>
      %172 = vector.shape_cast %169 : vector<8x8xf32> to vector<1x8x8xf32>
      tpu.vector_store %arg19[%c3_104, %c0_105, %c0_106], %172 {strides = array<i32>} : memref<4x8x8xf32, #tpu.memory_space<vmem>>, vector<1x8x8xf32>,
      %173 = vector.extract_strided_slice %144 {offsets = [0, 56], sizes = [8, 8], strides = [1, 1]} : vector<8x64xf32> to vector<8x8xf32>
      %c3_107 = arith.constant 3 : index
      %c0_108 = arith.constant 0 : index
      %c0_109 = arith.constant 0 : index
      %174 = vector.load %arg20[%c3_107, %c0_108, %c0_109] : memref<4x8x8xf32, #tpu.memory_space<vmem>>, vector<1x8x8xf32>
      %175 = vector.shape_cast %174 : vector<1x8x8xf32> to vector<8x8xf32>
      %176 = vector.shape_cast %173 : vector<8x8xf32> to vector<1x8x8xf32>
      tpu.vector_store %arg20[%c3_107, %c0_108, %c0_109], %176 {strides = array<i32>} : memref<4x8x8xf32, #tpu.memory_space<vmem>>, vector<1x8x8xf32>,
    } else {
    }
    %c0 = arith.constant 0 : index
    %c0_1 = arith.constant 0 : index
    %c0_2 = arith.constant 0 : index
    %3 = vector.load %arg3[%c0, %c0_1, %c0_2] : memref<1x8x32xf32, #tpu.memory_space<vmem>>, vector<1x8x32xf32>
    %4 = vector.shape_cast %3 : vector<1x8x32xf32> to vector<8x32xf32>
    %c0_3 = arith.constant 0 : index
    %c0_4 = arith.constant 0 : index
    %5 = vector.load %arg10[%c0_3, %c0_4] : memref<1x32xf32, #tpu.memory_space<vmem>>, vector<1x32xf32>
    %c0_5 = arith.constant 0 : index
    %c0_6 = arith.constant 0 : index
    %6 = vector.load %arg11[%c0_5, %c0_6] : memref<1x32xf32, #tpu.memory_space<vmem>>, vector<1x32xf32>
    %cst = arith.constant dense<0.000000e+00> : vector<8xf32>
    %7 = vector.multi_reduction <add>, %4, %cst [1] : vector<8x32xf32> to vector<8xf32>
    %8 = vector.shape_cast %7 : vector<8xf32> to vector<8x1xf32>
    %cst_7 = arith.constant 3.200000e+01 : f32
    %9 = vector.broadcast %cst_7 : f32 to vector<8x1xf32>
    %10 = arith.divf %8, %9 : vector<8x1xf32>
    %11 = vector.broadcast %10 : vector<8x1xf32> to vector<8x32xf32>
    %12 = arith.subf %4, %11 : vector<8x32xf32>
    %13 = arith.mulf %12, %12 : vector<8x32xf32>
    %cst_8 = arith.constant dense<0.000000e+00> : vector<8xf32>
    %14 = vector.multi_reduction <add>, %13, %cst_8 [1] : vector<8x32xf32> to vector<8xf32>
    %15 = vector.shape_cast %14 : vector<8xf32> to vector<8x1xf32>
    %cst_9 = arith.constant 3.200000e+01 : f32
    %16 = vector.broadcast %cst_9 : f32 to vector<8x1xf32>
    %17 = arith.divf %15, %16 : vector<8x1xf32>
    %18 = vector.broadcast %10 : vector<8x1xf32> to vector<8x32xf32>
    %19 = arith.subf %4, %18 : vector<8x32xf32>
    %cst_10 = arith.constant 9.99999997E-7 : f32
    %20 = vector.broadcast %cst_10 : f32 to vector<8x1xf32>
    %21 = arith.addf %17, %20 : vector<8x1xf32>
    %22 = math.rsqrt %21 : vector<8x1xf32>
    %23 = vector.broadcast %22 : vector<8x1xf32> to vector<8x32xf32>
    %24 = arith.mulf %19, %23 : vector<8x32xf32>
    %25 = vector.broadcast %5 : vector<1x32xf32> to vector<8x32xf32>
    %26 = arith.mulf %24, %25 : vector<8x32xf32>
    %27 = vector.broadcast %6 : vector<1x32xf32> to vector<8x32xf32>
    %28 = arith.addf %26, %27 : vector<8x32xf32>
    %c0_11 = arith.constant 0 : index
    %c0_12 = arith.constant 0 : index
    %29 = vector.load %arg4[%c0_11, %c0_12] : memref<32x32xf32, #tpu.memory_space<vmem>>, vector<32x32xf32>
    %cst_13 = arith.constant dense<0.000000e+00> : vector<8x32xf32>
    %30 = tpu.matmul %28, %29, %cst_13 {dimension_numbers = #tpu.dot_dimension_numbers<[1], [0], [0], [1], [0, 0, 1, 1], [], []>} : vector<8x32xf32>, vector<32x32xf32>, vector<8x32xf32> -> vector<8x32xf32>
    %c0_14 = arith.constant 0 : index
    %c0_15 = arith.constant 0 : index
    %31 = vector.load %arg5[%c0_14, %c0_15] : memref<1x32xf32, #tpu.memory_space<vmem>>, vector<1x32xf32>
    %32 = vector.broadcast %31 : vector<1x32xf32> to vector<8x32xf32>
    %33 = arith.addf %30, %32 : vector<8x32xf32>
    %cst_16 = arith.constant 0.353553385 : f32
    %34 = vector.broadcast %cst_16 : f32 to vector<8x32xf32>
    %35 = arith.mulf %33, %34 : vector<8x32xf32>
    %36 = vector.extract_strided_slice %35 {offsets = [0, 0], sizes = [8, 8], strides = [1, 1]} : vector<8x32xf32> to vector<8x8xf32>
    %c0_17 = arith.constant 0 : index
    %c0_18 = arith.constant 0 : index
    %c0_19 = arith.constant 0 : index
    %37 = vector.load %arg21[%c0_17, %c0_18, %c0_19] : memref<4x8x8xf32, #tpu.memory_space<vmem>>, vector<1x8x8xf32>
    %38 = vector.shape_cast %37 : vector<1x8x8xf32> to vector<8x8xf32>
    %39 = vector.shape_cast %36 : vector<8x8xf32> to vector<1x8x8xf32>
    tpu.vector_store %arg21[%c0_17, %c0_18, %c0_19], %39 {strides = array<i32>} : memref<4x8x8xf32, #tpu.memory_space<vmem>>, vector<1x8x8xf32>,
    %40 = vector.extract_strided_slice %35 {offsets = [0, 8], sizes = [8, 8], strides = [1, 1]} : vector<8x32xf32> to vector<8x8xf32>
    %c1 = arith.constant 1 : index
    %c0_20 = arith.constant 0 : index
    %c0_21 = arith.constant 0 : index
    %41 = vector.load %arg21[%c1, %c0_20, %c0_21] : memref<4x8x8xf32, #tpu.memory_space<vmem>>, vector<1x8x8xf32>
    %42 = vector.shape_cast %41 : vector<1x8x8xf32> to vector<8x8xf32>
    %43 = vector.shape_cast %40 : vector<8x8xf32> to vector<1x8x8xf32>
    tpu.vector_store %arg21[%c1, %c0_20, %c0_21], %43 {strides = array<i32>} : memref<4x8x8xf32, #tpu.memory_space<vmem>>, vector<1x8x8xf32>,
    %44 = vector.extract_strided_slice %35 {offsets = [0, 16], sizes = [8, 8], strides = [1, 1]} : vector<8x32xf32> to vector<8x8xf32>
    %c2 = arith.constant 2 : index
    %c0_22 = arith.constant 0 : index
    %c0_23 = arith.constant 0 : index
    %45 = vector.load %arg21[%c2, %c0_22, %c0_23] : memref<4x8x8xf32, #tpu.memory_space<vmem>>, vector<1x8x8xf32>
    %46 = vector.shape_cast %45 : vector<1x8x8xf32> to vector<8x8xf32>
    %47 = vector.shape_cast %44 : vector<8x8xf32> to vector<1x8x8xf32>
    tpu.vector_store %arg21[%c2, %c0_22, %c0_23], %47 {strides = array<i32>} : memref<4x8x8xf32, #tpu.memory_space<vmem>>, vector<1x8x8xf32>,
    %48 = vector.extract_strided_slice %35 {offsets = [0, 24], sizes = [8, 8], strides = [1, 1]} : vector<8x32xf32> to vector<8x8xf32>
    %c3 = arith.constant 3 : index
    %c0_24 = arith.constant 0 : index
    %c0_25 = arith.constant 0 : index
    %49 = vector.load %arg21[%c3, %c0_24, %c0_25] : memref<4x8x8xf32, #tpu.memory_space<vmem>>, vector<1x8x8xf32>
    %50 = vector.shape_cast %49 : vector<1x8x8xf32> to vector<8x8xf32>
    %51 = vector.shape_cast %48 : vector<8x8xf32> to vector<1x8x8xf32>
    tpu.vector_store %arg21[%c3, %c0_24, %c0_25], %51 {strides = array<i32>} : memref<4x8x8xf32, #tpu.memory_space<vmem>>, vector<1x8x8xf32>,
    %c0_26 = arith.constant 0 : index
    %c0_27 = arith.constant 0 : index
    %c0_28 = arith.constant 0 : index
    %52 = vector.load %arg21[%c0_26, %c0_27, %c0_28] : memref<4x8x8xf32, #tpu.memory_space<vmem>>, vector<4x8x8xf32>
    %c0_29 = arith.constant 0 : index
    %c0_30 = arith.constant 0 : index
    %c0_31 = arith.constant 0 : index
    %53 = vector.load %arg19[%c0_29, %c0_30, %c0_31] : memref<4x8x8xf32, #tpu.memory_space<vmem>>, vector<4x8x8xf32>
    "tpu.trace_start"() <{level = 10 : i32, message = "hqd,hkd->hqk"}> : () -> ()
    %cst_32 = arith.constant dense<0.000000e+00> : vector<4x8x8xf32>
    %54 = tpu.matmul %52, %53, %cst_32 {dimension_numbers = #tpu.dot_dimension_numbers<[2], [2], [1], [1], [0, 0, 0, 1, 1, 1], [0], [0]>} : vector<4x8x8xf32>, vector<4x8x8xf32>, vector<4x8x8xf32> -> vector<4x8x8xf32>
    "tpu.trace_stop"() : () -> ()
    %cst_33 = arith.constant dense<0xFF800000> : vector<4x8xf32>
    %55 = vector.multi_reduction <maximumf>, %54, %cst_33 [2] : vector<4x8x8xf32> to vector<4x8xf32>
    %56 = vector.shape_cast %55 : vector<4x8xf32> to vector<4x8x1xf32>
    %57 = vector.broadcast %56 : vector<4x8x1xf32> to vector<4x8x8xf32>
    %58 = arith.subf %54, %57 : vector<4x8x8xf32>
    %59 = math.exp %58 : vector<4x8x8xf32>
    %cst_34 = arith.constant dense<0.000000e+00> : vector<4x8xf32>
    %60 = vector.multi_reduction <add>, %59, %cst_34 [2] : vector<4x8x8xf32> to vector<4x8xf32>
    %61 = vector.shape_cast %60 : vector<4x8xf32> to vector<4x8x1xf32>
    %62 = tpu.reciprocal %61 {approx = true} : vector<4x8x1xf32> -> vector<4x8x1xf32>
    %63 = vector.broadcast %62 : vector<4x8x1xf32> to vector<4x8x8xf32>
    %64 = arith.mulf %59, %63 : vector<4x8x8xf32>
    %c0_35 = arith.constant 0 : index
    %c0_36 = arith.constant 0 : index
    %c0_37 = arith.constant 0 : index
    %65 = vector.load %arg20[%c0_35, %c0_36, %c0_37] : memref<4x8x8xf32, #tpu.memory_space<vmem>>, vector<4x8x8xf32>
    "tpu.trace_start"() <{level = 10 : i32, message = "hqk,hkd->hqd"}> : () -> ()
    %cst_38 = arith.constant dense<0.000000e+00> : vector<4x8x8xf32>
    %66 = tpu.matmul %64, %65, %cst_38 {dimension_numbers = #tpu.dot_dimension_numbers<[2], [1], [1], [2], [0, 0, 0, 1, 1, 2], [0], [0]>} : vector<4x8x8xf32>, vector<4x8x8xf32>, vector<4x8x8xf32> -> vector<4x8x8xf32>
    "tpu.trace_stop"() : () -> ()
    %c0_39 = arith.constant 0 : index
    %c0_40 = arith.constant 0 : index
    %c0_41 = arith.constant 0 : index
    %67 = vector.load %arg8[%c0_39, %c0_40, %c0_41] : memref<4x8x32xf32, #tpu.memory_space<vmem>>, vector<4x8x32xf32>
    "tpu.trace_start"() <{level = 10 : i32, message = "hqd,hde->hqe"}> : () -> ()
    %cst_42 = arith.constant dense<0.000000e+00> : vector<4x8x32xf32>
    %68 = tpu.matmul %66, %67, %cst_42 {dimension_numbers = #tpu.dot_dimension_numbers<[2], [1], [1], [2], [0, 0, 0, 1, 1, 2], [0], [0]>} : vector<4x8x8xf32>, vector<4x8x32xf32>, vector<4x8x32xf32> -> vector<4x8x32xf32>
    "tpu.trace_stop"() : () -> ()
    %cst_43 = arith.constant dense<0.000000e+00> : vector<8x32xf32>
    %69 = vector.multi_reduction <add>, %68, %cst_43 [0] : vector<4x8x32xf32> to vector<8x32xf32>
    %c0_44 = arith.constant 0 : index
    %c0_45 = arith.constant 0 : index
    %70 = vector.load %arg9[%c0_44, %c0_45] : memref<1x32xf32, #tpu.memory_space<vmem>>, vector<1x32xf32>
    %71 = vector.broadcast %70 : vector<1x32xf32> to vector<8x32xf32>
    %72 = arith.addf %69, %71 : vector<8x32xf32>
    %73 = arith.addf %4, %72 : vector<8x32xf32>
    %c0_46 = arith.constant 0 : index
    %c0_47 = arith.constant 0 : index
    %74 = vector.load %arg12[%c0_46, %c0_47] : memref<1x32xf32, #tpu.memory_space<vmem>>, vector<1x32xf32>
    %c0_48 = arith.constant 0 : index
    %c0_49 = arith.constant 0 : index
    %75 = vector.load %arg13[%c0_48, %c0_49] : memref<1x32xf32, #tpu.memory_space<vmem>>, vector<1x32xf32>
    %cst_50 = arith.constant dense<0.000000e+00> : vector<8xf32>
    %76 = vector.multi_reduction <add>, %73, %cst_50 [1] : vector<8x32xf32> to vector<8xf32>
    %77 = vector.shape_cast %76 : vector<8xf32> to vector<8x1xf32>
    %cst_51 = arith.constant 3.200000e+01 : f32
    %78 = vector.broadcast %cst_51 : f32 to vector<8x1xf32>
    %79 = arith.divf %77, %78 : vector<8x1xf32>
    %80 = vector.broadcast %79 : vector<8x1xf32> to vector<8x32xf32>
    %81 = arith.subf %73, %80 : vector<8x32xf32>
    %82 = arith.mulf %81, %81 : vector<8x32xf32>
    %cst_52 = arith.constant dense<0.000000e+00> : vector<8xf32>
    %83 = vector.multi_reduction <add>, %82, %cst_52 [1] : vector<8x32xf32> to vector<8xf32>
    %84 = vector.shape_cast %83 : vector<8xf32> to vector<8x1xf32>
    %cst_53 = arith.constant 3.200000e+01 : f32
    %85 = vector.broadcast %cst_53 : f32 to vector<8x1xf32>
    %86 = arith.divf %84, %85 : vector<8x1xf32>
    %87 = vector.broadcast %79 : vector<8x1xf32> to vector<8x32xf32>
    %88 = arith.subf %73, %87 : vector<8x32xf32>
    %cst_54 = arith.constant 9.99999997E-7 : f32
    %89 = vector.broadcast %cst_54 : f32 to vector<8x1xf32>
    %90 = arith.addf %86, %89 : vector<8x1xf32>
    %91 = math.rsqrt %90 : vector<8x1xf32>
    %92 = vector.broadcast %91 : vector<8x1xf32> to vector<8x32xf32>
    %93 = arith.mulf %88, %92 : vector<8x32xf32>
    %94 = vector.broadcast %74 : vector<1x32xf32> to vector<8x32xf32>
    %95 = arith.mulf %93, %94 : vector<8x32xf32>
    %96 = vector.broadcast %75 : vector<1x32xf32> to vector<8x32xf32>
    %97 = arith.addf %95, %96 : vector<8x32xf32>
    %c0_55 = arith.constant 0 : index
    %c0_56 = arith.constant 0 : index
    %98 = vector.load %arg14[%c0_55, %c0_56] : memref<32x64xf32, #tpu.memory_space<vmem>>, vector<32x64xf32>
    %cst_57 = arith.constant dense<0.000000e+00> : vector<8x64xf32>
    %99 = tpu.matmul %97, %98, %cst_57 {dimension_numbers = #tpu.dot_dimension_numbers<[1], [0], [0], [1], [0, 0, 1, 1], [], []>} : vector<8x32xf32>, vector<32x64xf32>, vector<8x64xf32> -> vector<8x64xf32>
    %c0_58 = arith.constant 0 : index
    %c0_59 = arith.constant 0 : index
    %100 = vector.load %arg15[%c0_58, %c0_59] : memref<1x64xf32, #tpu.memory_space<vmem>>, vector<1x64xf32>
    %101 = vector.broadcast %100 : vector<1x64xf32> to vector<8x64xf32>
    %102 = arith.addf %99, %101 : vector<8x64xf32>
    %cst_60 = arith.constant 0.000000e+00 : f32
    %103 = vector.broadcast %cst_60 : f32 to vector<8x64xf32>
    %104 = arith.maximumf %102, %103 : vector<8x64xf32>
    %c0_61 = arith.constant 0 : index
    %c0_62 = arith.constant 0 : index
    %105 = vector.load %arg16[%c0_61, %c0_62] : memref<64x32xf32, #tpu.memory_space<vmem>>, vector<64x32xf32>
    %cst_63 = arith.constant dense<0.000000e+00> : vector<8x32xf32>
    %106 = tpu.matmul %104, %105, %cst_63 {dimension_numbers = #tpu.dot_dimension_numbers<[1], [0], [0], [1], [0, 0, 1, 1], [], []>} : vector<8x64xf32>, vector<64x32xf32>, vector<8x32xf32> -> vector<8x32xf32>
    %c0_64 = arith.constant 0 : index
    %c0_65 = arith.constant 0 : index
    %107 = vector.load %arg17[%c0_64, %c0_65] : memref<1x32xf32, #tpu.memory_space<vmem>>, vector<1x32xf32>
    %108 = vector.broadcast %107 : vector<1x32xf32> to vector<8x32xf32>
    %109 = arith.addf %106, %108 : vector<8x32xf32>
    %110 = arith.addf %73, %109 : vector<8x32xf32>
    %c0_66 = arith.constant 0 : index
    %c0_67 = arith.constant 0 : index
    %c0_68 = arith.constant 0 : index
    %111 = vector.load %arg18[%c0_66, %c0_67, %c0_68] : memref<1x8x32xf32, #tpu.memory_space<vmem>>, vector<1x8x32xf32>
    %112 = vector.shape_cast %111 : vector<1x8x32xf32> to vector<8x32xf32>
    %113 = vector.shape_cast %110 : vector<8x32xf32> to vector<1x8x32xf32>
    tpu.vector_store %arg18[%c0_66, %c0_67, %c0_68], %113 {strides = array<i32>} : memref<1x8x32xf32, #tpu.memory_space<vmem>>, vector<1x8x32xf32>,
    return
  }
  func.func @transform_0(%arg0: i32, %arg1: i32) -> (i32, i32, i32) {
    %c0_i32 = arith.constant 0 : i32
    %c0_i32_0 = arith.constant 0 : i32
    %c0_i32_1 = arith.constant 0 : i32
    return %arg0, %c0_i32, %c0_i32_0 : i32, i32, i32
  }
  func.func @transform_1(%arg0: i32, %arg1: i32) -> (i32, i32, i32) {
    %c0_i32 = arith.constant 0 : i32
    %c0_i32_0 = arith.constant 0 : i32
    return %arg0, %arg1, %c0_i32 : i32, i32, i32
  }
  func.func @transform_2(%arg0: i32, %arg1: i32) -> (i32, i32) {
    %c0_i32 = arith.constant 0 : i32
    %c0_i32_0 = arith.constant 0 : i32
    %c0_i32_1 = arith.constant 0 : i32
    return %c0_i32, %c0_i32_0 : i32, i32
  }
  func.func @transform_3(%arg0: i32, %arg1: i32) -> (i32, i32) {
    %c0_i32 = arith.constant 0 : i32
    %c0_i32_0 = arith.constant 0 : i32
    %c0_i32_1 = arith.constant 0 : i32
    return %c0_i32, %c0_i32_0 : i32, i32
  }
  func.func @transform_4(%arg0: i32, %arg1: i32) -> (i32, i32) {
    %c0_i32 = arith.constant 0 : i32
    %c0_i32_0 = arith.constant 0 : i32
    %c0_i32_1 = arith.constant 0 : i32
    return %c0_i32, %c0_i32_0 : i32, i32
  }
  func.func @transform_5(%arg0: i32, %arg1: i32) -> (i32, i32) {
    %c0_i32 = arith.constant 0 : i32
    %c0_i32_0 = arith.constant 0 : i32
    %c0_i32_1 = arith.constant 0 : i32
    return %c0_i32, %c0_i32_0 : i32, i32
  }
  func.func @transform_6(%arg0: i32, %arg1: i32) -> (i32, i32, i32) {
    %c0_i32 = arith.constant 0 : i32
    %c0_i32_0 = arith.constant 0 : i32
    %c0_i32_1 = arith.constant 0 : i32
    %c0_i32_2 = arith.constant 0 : i32
    return %c0_i32, %c0_i32_0, %c0_i32_1 : i32, i32, i32
  }
  func.func @transform_7(%arg0: i32, %arg1: i32) -> (i32, i32) {
    %c0_i32 = arith.constant 0 : i32
    %c0_i32_0 = arith.constant 0 : i32
    %c0_i32_1 = arith.constant 0 : i32
    return %c0_i32, %c0_i32_0 : i32, i32
  }
  func.func @transform_8(%arg0: i32, %arg1: i32) -> (i32, i32) {
    %c0_i32 = arith.constant 0 : i32
    %c0_i32_0 = arith.constant 0 : i32
    %c0_i32_1 = arith.constant 0 : i32
    return %c0_i32, %c0_i32_0 : i32, i32
  }
  func.func @transform_9(%arg0: i32, %arg1: i32) -> (i32, i32) {
    %c0_i32 = arith.constant 0 : i32
    %c0_i32_0 = arith.constant 0 : i32
    %c0_i32_1 = arith.constant 0 : i32
    return %c0_i32, %c0_i32_0 : i32, i32
  }
  func.func @transform_10(%arg0: i32, %arg1: i32) -> (i32, i32) {
    %c0_i32 = arith.constant 0 : i32
    %c0_i32_0 = arith.constant 0 : i32
    %c0_i32_1 = arith.constant 0 : i32
    return %c0_i32, %c0_i32_0 : i32, i32
  }
  func.func @transform_11(%arg0: i32, %arg1: i32) -> (i32, i32) {
    %c0_i32 = arith.constant 0 : i32
    %c0_i32_0 = arith.constant 0 : i32
    %c0_i32_1 = arith.constant 0 : i32
    return %c0_i32, %c0_i32_0 : i32, i32
  }
  func.func @transform_12(%arg0: i32, %arg1: i32) -> (i32, i32) {
    %c0_i32 = arith.constant 0 : i32
    %c0_i32_0 = arith.constant 0 : i32
    %c0_i32_1 = arith.constant 0 : i32
    return %c0_i32, %c0_i32_0 : i32, i32
  }
  func.func @transform_13(%arg0: i32, %arg1: i32) -> (i32, i32) {
    %c0_i32 = arith.constant 0 : i32
    %c0_i32_0 = arith.constant 0 : i32
    %c0_i32_1 = arith.constant 0 : i32
    return %c0_i32, %c0_i32_0 : i32, i32
  }
  func.func @transform_14(%arg0: i32, %arg1: i32) -> (i32, i32) {
    %c0_i32 = arith.constant 0 : i32
    %c0_i32_0 = arith.constant 0 : i32
    %c0_i32_1 = arith.constant 0 : i32
    return %c0_i32, %c0_i32_0 : i32, i32
  }
  func.func @transform_15(%arg0: i32, %arg1: i32) -> (i32, i32) {
    %c0_i32 = arith.constant 0 : i32
    %c0_i32_0 = arith.constant 0 : i32
    %c0_i32_1 = arith.constant 0 : i32
    return %c0_i32, %c0_i32_0 : i32, i32
  }
  func.func @transform_16(%arg0: i32, %arg1: i32) -> (i32, i32, i32) {
    %c0_i32 = arith.constant 0 : i32
    %c0_i32_0 = arith.constant 0 : i32
    return %arg0, %arg1, %c0_i32 : i32, i32, i32
  }
}

</mosaic_0001>

<bundles_post_ra>
// kernel: tpu_custom_call.1
= control target key start
LH: loop header
LB: loop body
LE: loop exit
PB: predicated region body
PF: predicated region fallthrough
CT: control target
= control target key end

     0   :  { %s3282_s0 = inlined_call_operand.hbm [shape: f32[2,8,32], index: 0, kind: input, shape index: {}]   ;;  %s3283_s1 = inlined_call_operand.hbm [shape: f32[2,8,32], index: 1, kind: input, shape index: {}]   ;;  %s3284_s2 = inlined_call_operand.vmem [shape: f32[32,32], index: 2, kind: input, shape index: {}]   ;;  %s3285_s3 = inlined_call_operand.vmem [shape: f32[1,32], index: 3, kind: input, shape index: {}]   ;;  %s3286_s4 = inlined_call_operand.vmem [shape: f32[32,64], index: 4, kind: input, shape index: {}]   ;;  %s3287_s5 = inlined_call_operand.vmem [shape: f32[1,64], index: 5, kind: input, shape index: {}]   ;;  %s3288_s6 = inlined_call_operand.vmem [shape: f32[4,8,32], index: 6, kind: input, shape index: {}]   ;;  %s3289_s7 = inlined_call_operand.vmem [shape: f32[1,32], index: 7, kind: input, shape index: {}]   ;;  %s3290_s8 = inlined_call_operand.vmem [shape: f32[1,32], index: 8, kind: input, shape index: {}]   ;;  %s3291_s9 = inlined_call_operand.vmem [shape: f32[1,32], index: 9, kind: input, shape index: {}]   ;;  %s3292_s10 = inlined_call_operand.vmem [shape: f32[1,32], index: 10, kind: input, shape index: {}]   ;;  %s3293_s11 = inlined_call_operand.vmem [shape: f32[1,32], index: 11, kind: input, shape index: {}]   ;;  %s3294_s12 = inlined_call_operand.hbm [shape: f32[32,64], index: 12, kind: input, shape index: {}]   ;;  %s3295_s13 = inlined_call_operand.vmem [shape: f32[1,64], index: 13, kind: input, shape index: {}]   ;;  %s3296_s14 = inlined_call_operand.vmem [shape: f32[64,32], index: 14, kind: input, shape index: {}]   ;;  %s3297_s15 = inlined_call_operand.vmem [shape: f32[1,32], index: 15, kind: input, shape index: {}]   ;;  %s3298_s16 = inlined_call_operand.hbm [shape: f32[2,8,32], index: 16, kind: output, shape index: {}]  }
   0x1   :  { %3313 = sst [smem:[#allocation24_spill]] %s3282_s0 }
   0x2   :  { %3314 = sst [smem:[#allocation25_spill]] %s3292_s10 }
   0x3   :  { %3315 = sst [smem:[#allocation26_spill]] %s3293_s11 }
   0x4   :  { %3316 = sst [smem:[#allocation27_spill]] %s3294_s12 }
   0x5   :  { %3317 = sst [smem:[#allocation28_spill]] %s3295_s13 }
   0x6   :  { %3318 = sst [smem:[#allocation29_spill]] %s3296_s14 }
   0x7   :  { %3319 = sst [smem:[#allocation30_spill]] %s3297_s15 }
   0x8   :  { %3320 = sst [smem:[#allocation31_spill]] %s3298_s16 }
   0x9   :  { %21 = vsyncpa [#allocation6], 0 }
   0xa   :  { %23 = vsyncpa [#allocation6 + $0x1], 0 }
   0xb   :  { %24 = vsyncpa [#allocation9], 0 }
   0xc   :  { %26 = vsyncpa [#allocation9 + $0x1], 0 }
   0xd   :  { %27 = vsyncpa [#allocation7], 0 }
   0xe   :  { %29 = vsyncpa [#allocation7 + $0x1], 0  ;;  %s2825_s21 = smov 0   ;;  %s2827_s22 = smov 0  }
   0xf   :  { %s2829_s23 = smov 0   ;;  %s2831_s24 = smov 0  }
  0x10   :  { %s2833_s25 = smov 0   ;;  %s2835_s26 = smov 0  }
  0x11 LB: > { %3321 = sst [smem:[#allocation16_spill]] %s2702_s21  ;;  %s2856_s27 = sadd.s32 4294967295, %s2722_s26   ;;  %s2722_s26 = sphi %s2835_s26, %s35_s26   ;;  %s2718_s25 = sphi %s2833_s25, %s3359_s25   ;;  %s2714_s24 = sphi %s2831_s24, %s3358_s24   ;;  %s2710_s23 = sphi %s2829_s23, %s3362_s23   ;;  %s2706_s22 = sphi %s2827_s22, %s3361_s22   ;;  %s2702_s21 = sphi %s2825_s21, %s3360_s21  }
  0x12   : > { %3322 = sst [smem:[#allocation17_spill]] %s2710_s23  ;;  %s2194_s28 = sadd.s32 4294967294, %s2722_s26  }
  0x13   : > { %3323 = sst [smem:[#allocation18_spill]] %s2714_s24  ;;  %p67_p0 = scmp.ne.s32.totalorder %s2706_s22, %s2702_s21 }
  0x14   : > { %3324 = sst [smem:[#allocation19_spill]] %s2718_s25  ;;  %p3303_p1 = scmp.eq.s32.totalorder %s2856_s27, 0 }
  0x15   : > { %p421_p3 = scmp.eq.s32.totalorder %s2194_s28, 1  ;;  %p2195_p5 = scmp.ge.s32.totalorder %s2722_s26, 1 }
  0x16   : > { %p2865_p4 = por %p3303_p1, %p67_p0  ;;  %p428_p7 = scmp.lt.s32.totalorder %s2722_s26, 3 }
  0x17   : > { %p2870_p6 = por %p421_p3, %p67_p0  ;;  %s2724_s17 = smov [#allocation10]  }
  0x18   : > { %s3325_s29 = scalar_select %p2865_p4, 1, 0 }
  0x19   : > { %s3326_s30 = scalar_select %p2870_p6, 1, 0 }
  0x1a   : > { %p2875_p8 = pnand %p2195_p5, %p428_p7  ;;  %s470_s18 = sshll.u32 %s2724_s17, 4  ;;  %s471_s18 = int_to_ptr.vmem [resolvable:$true] %s470_s18 }
  0x1b   : > { %3327 = sst [smem:[#allocation20_spill]] %s3326_s30  ;;  %s47_s20 = sadd.s32 1, %s2718_s25 }
  0x1c   : > { %s3328_s0 = scalar_select %p2875_p8, 1, 0 }
  0x1d   : > { %p2442_p9 = pneg %p2875_p8  ;;  %s3330_s12 = sld [smem:[#allocation27_spill]] }
  0x1f   : > { %p2884_p11 = pnand %p2442_p9, %p3303_p1 }
  0x21   : > { %p2546_p13 = pneg %p2884_p11 }
  0x23   : > { %s2544_s21 = scalar_lea.hbm %s3330_s12, 512 }
  0x24   : > { %p2545_p12 = scmp.ne.s32.totalorder %s3330_s12, %s2544_s21  ;;  %p2551_p5 = scmp.lt.u32.totalorder %s2544_s21, %s3330_s12 }
  0x26   : > { %p2547_p0 = pnand %p2546_p13, %p2545_p12 }
  0x28   : > { %p2548_p3 = pneg %p2547_p0 }
  0x2a   : > { %p2553_p7 = pnand %p2551_p5, %p2548_p3 }
  0x2c   : > { %2556 = shalt.err (!%p2553_p7)
}
  0x2d   : > { %s2557_s24 = scalar_lea.vmem %s471_s18, 512  ;;  %p2565_p2 = scmp.lt.s32.totalorder %s471_s18, %s471_s18 }
  0x2e   : > { %p2558_p9 = scmp.ne.s32.totalorder %s471_s18, %s2557_s24  ;;  %p2566_p6 = scmp.lt.s32.totalorder %s2557_s24, %s2557_s24 }
  0x30   : > { %p2560_p10 = pnand %p2558_p9, %p2546_p13  ;;  %p2567_p4 = por %p2566_p6, %p2565_p2 }
  0x32   : > { %p2561_p1 = pneg %p2560_p10 }
  0x34   : > { %p2568_p8 = pnand %p2567_p4, %p2561_p1 }
  0x36   : > { %2571 = shalt.err (!%p2568_p8)
}
  0x37   : > { %s2725_s15 = smov 128   ;;  %s2726_s13 = smov 8  }
  0x38   : > { %2445 = dma.hbm_to_vmem [thread:$0]  (!%p2884_p11), %s3330_s12, 512, %s471_s18, [#allocation9], %s2725_s15, %s2725_s15, %s2726_s13  }
  0x39   : > { %p49_p1 = scmp.ge.s32.totalorder %s47_s20, 2  ;;  %s54_s24 = sadd.s32 1, %s2710_s23 }
  0x3a   : > { %p61_p2 = scmp.ne.s32.totalorder %s2710_s23, %s2706_s22  ;;  %p62_p4 = scmp.eq.s32.totalorder %s2722_s26, 0 }
  0x3b   : > { %s3364_s20 = smov (%p49_p1, %s47_s20), 0  ;;  %p3333_p8 = scmp.eq.s32.totalorder %s2856_s27, 1 }
  0x3c   : > { %3331 = sst [smem:[#allocation21_spill]] %s3364_s20  ;;  %p2911_p6 = por %p62_p4, %p61_p2 }
  0x3d   : > { %p2917_p10 = por %p3333_p8, %p61_p2  ;;  %s51_s28 = ssub.s32 %s2718_s25, %s3364_s20 }
  0x3e   : > { %p2458_p11 = scmp.lt.s32.totalorder %s2722_s26, 2  ;;  %p52_p12 = scmp.eq.s32.totalorder %s51_s28, 0 }
  0x3f   : > { %s3334_s19 = scalar_select %p2917_p10, 1, 0 }
  0x40   : > { %s493_s18 = sand.u32 1, %s2710_s23   ;;  %s2199_s13 = sshll.u32 %s2718_s25, 7 }
  0x41   : > { %3335 = sst [smem:[#allocation22_spill]] %s3334_s19  ;;  %s2925_s17 = sshll.u32 %s493_s18, 3 }
  0x42   : > { %s2928_s15 = scalar_select %p52_p12, %s2710_s23, %s54_s24  }
  0x43   : > { %s3337_s12 = sld [smem:[#allocation24_spill]]  ;;  %s497_s10 = scalar_lea.vmem [#allocation5], %s2925_s17 }
  0x44   : > { %3336 = sst [smem:[#allocation23_spill]] %s2928_s15  ;;  %s504_s20 = sshll.u32 %s497_s10, 4  ;;  %s2937_s20 = int_to_ptr.vmem [resolvable:$true] %s504_s20 }
  0x45   : > { %p2941_p13 = pnand %p2458_p11, %p2911_p6  ;;  %s2948_s16 = scalar_lea.hbm %s3283_s1, %s2199_s13 }
  0x46   : > { %s511_s21 = sand.u32 1, %s2722_s26   ;;  %s494_s15 = scalar_lea.sflag [#allocation6], %s493_s18 }
  0x47   : > { %p2574_p3 = pneg %p2941_p13 }
  0x49   : > { %s2934_s11 = scalar_lea.hbm %s3337_s12, %s2199_s13  ;;  %s2577_s19 = scalar_lea.hbm %s3337_s12, 256 }
  0x4a   : > { %s2572_s23 = scalar_lea.hbm %s2934_s11, 128  ;;  %p2578_p9 = scmp.lt.u32.totalorder %s2934_s11, %s3337_s12 }
  0x4b   : > { %p2573_p0 = scmp.ne.s32.totalorder %s2934_s11, %s2572_s23  ;;  %p2579_p1 = scmp.lt.u32.totalorder %s2577_s19, %s2572_s23 }
  0x4c   : > { %p2581_p4 = scmp.lt.u32.totalorder %s2572_s23, %s2934_s11 }
  0x4d   : > { %p2575_p5 = pnand %p2574_p3, %p2573_p0  ;;  %p2580_p2 = por %p2579_p1, %p2578_p9 }
  0x4f   : > { %p2576_p7 = pneg %p2575_p5  ;;  %p2582_p6 = por %p2581_p4, %p2580_p2 }
  0x51   : > { %p2583_p8 = pnand %p2582_p6, %p2576_p7 }
  0x53   : > { %2586 = shalt.err (!%p2583_p8)
}
  0x54   : > { %s2587_s18 = scalar_lea.vmem %s2937_s20, 128  ;;  %s2727_s13 = smov [#allocation5]  }
  0x55   : > { %p2588_p11 = scmp.ne.s32.totalorder %s2937_s20, %s2587_s18  ;;  %s2592_s24 = sshll.u32 %s2727_s13, 4  ;;  %s2593_s24 = int_to_ptr.vmem [resolvable:$false] %s2592_s24 }
  0x56   : > { %s2594_s14 = scalar_lea.vmem %s2593_s24, 256  ;;  %p2595_p5 = scmp.lt.s32.totalorder %s2937_s20, %s2593_s24 }
  0x57   : > { %p2590_p12 = pnand %p2588_p11, %p2574_p3  ;;  %p2596_p9 = scmp.lt.s32.totalorder %s2594_s14, %s2587_s18 }
  0x59   : > { %p2591_p0 = pneg %p2590_p12  ;;  %p2597_p1 = por %p2596_p9, %p2595_p5 }
  0x5b   : > { %p2598_p2 = pnand %p2597_p1, %p2591_p0 }
  0x5d   : > { %2601 = shalt.err (!%p2598_p2)
}
  0x5e   : > { %2449 = dma.hbm_to_vmem [thread:$0]  (!%p2941_p13), %s2934_s11, 128, %s2937_s20, %s494_s15  }
  0x5f   : > { %s515_s23 = scalar_lea.vmem [#allocation8], %s2925_s17  ;;  %s512_s10 = scalar_lea.sflag [#allocation9], %s511_s21 }
  0x60   : > { %s523_s19 = sshll.u32 %s515_s23, 4  ;;  %s2602_s30 = scalar_lea.hbm %s2948_s16, 128  ;;  %s524_s19 = int_to_ptr.vmem [resolvable:$true] %s523_s19 }
  0x61   : > { %p2603_p7 = scmp.ne.s32.totalorder %s2948_s16, %s2602_s30  ;;  %s2607_s13 = scalar_lea.hbm %s3283_s1, 256 }
  0x62   : > { %p2608_p8 = scmp.lt.u32.totalorder %s2948_s16, %s3283_s1  ;;  %p2609_p11 = scmp.lt.u32.totalorder %s2607_s13, %s2602_s30 }
  0x63   : > { %p2605_p4 = pnand %p2603_p7, %p2574_p3  ;;  %p2611_p0 = scmp.lt.u32.totalorder %s2602_s30, %s2948_s16 }
  0x64   : > { %p2610_p12 = por %p2609_p11, %p2608_p8 }
  0x65   : > { %p2606_p6 = pneg %p2605_p4 }
  0x66   : > { %p2612_p5 = por %p2611_p0, %p2610_p12 }
  0x68   : > { %p2613_p9 = pnand %p2612_p5, %p2606_p6 }
  0x6a   : > { %2616 = shalt.err (!%p2613_p9)
}
  0x6b   : > { %s2617_s11 = scalar_lea.vmem %s524_s19, 128  ;;  %s2728_s20 = smov [#allocation8]  }
  0x6c   : > { %p2618_p1 = scmp.ne.s32.totalorder %s524_s19, %s2617_s11  ;;  %s2622_s17 = sshll.u32 %s2728_s20, 4  ;;  %s2623_s17 = int_to_ptr.vmem [resolvable:$false] %s2622_s17 }
  0x6d   : > { %s2624_s15 = scalar_lea.vmem %s2623_s17, 256  ;;  %p2625_p4 = scmp.lt.s32.totalorder %s524_s19, %s2623_s17 }
  0x6e   : > { %p2620_p2 = pnand %p2618_p1, %p2574_p3  ;;  %p2626_p10 = scmp.lt.s32.totalorder %s2624_s15, %s2617_s11 }
  0x70   : > { %p2621_p7 = pneg %p2620_p2  ;;  %p2627_p8 = por %p2626_p10, %p2625_p4 }
  0x72   : > { %p2628_p11 = pnand %p2627_p8, %p2621_p7 }
  0x74   : > { %2631 = shalt.err (!%p2628_p11)
}
  0x75   : > { %2452 = dma.hbm_to_vmem [thread:$0]  (!%p2941_p13), %s2948_s16, 128, %s524_s19, %s512_s10  }
  0x76   : > { %p3339_p6 = scmp.ne.s32.totalorder %s3328_s0, 0 }
  0x77   : > { %s3001_s21 = sand.u32 (!%p3339_p6), 1, %s2706_s22   ;;  %p3340_p10 = scmp.ne.s32.totalorder (!%p3339_p6), %s3325_s29, 0 }
  0x78   : > { %532 = sbr.rel (%p3339_p6) target bundleno = 2523 (0x9db), region = 84  ;;  %s3004_s23 = sshll.u32 (!%p3339_p6), %s3001_s21, 3 }
  0x79   : > { %s535_s30 = scalar_lea.sflag (!%p3339_p6), [#allocation6], %s3001_s21  ;;  %s538_s25 = scalar_lea.vmem (!%p3339_p6), [#allocation5], %s3004_s23 }
  0x7f   : > { %2685 = dma.done.wait (%p3340_p10), %s535_s30, 128  }
  0x80   : > { %2687 = vsyncadd (%p3340_p10), %s535_s30, 4294967168  ;;  %s543_s0 = sand.u32 1, %s2856_s27   ;;  %s547_s16 = scalar_lea.vmem [#allocation8], %s3004_s23 }
  0x81   : > { %s544_s28 = scalar_lea.sflag [#allocation9], %s543_s0 }
  0x82   : > { %2689 = dma.done.wait (%p3340_p10), %s544_s28, 128  }
  0x83   : > { %2691 = vsyncadd (%p3340_p10), %s544_s28, 4294967168  ;;  %p3341_p13 = scmp.eq.s32.totalorder %s2856_s27, 0 }
  0x85   : > { %2693 = dma.done.wait (%p3341_p13), [#allocation9], 512   ;;  %p3342_p3 = pmov %p3341_p13 }
  0x86   : > { %vm612_vm0 = vcmask 261120   ;;  %v609_v0 = vld [vmem:[%s538_s25] sm:$0xff]  ;;  %v3022_v1 = vld [vmem:[%s547_s16] sm:$0xff]  ;;  %v2729_v17 = vmov 0.0|0.0   ;;  %vm2730_vm1 = vmmov 0   ;;  %v2731_v23 = vmov 0.0  }
  0x87   : > { %2695 = vsyncadd (%p3342_p3), [#allocation9], 4294966784  ;;  %v613_v2 = vsel %vm612_vm0, %v609_v0, 0.0  ;;  %v766_v3 = vsel %vm612_vm0, %v3022_v1, 0.0  ;;  %v641_v14 = vld [vmem:[%s3286_s4] sm:$0xff]  ;;  %v642_v15 = vld [vmem:[%s3286_s4 + $0x8] sm:$0xff]  ;;  %2402 = vmatprep.subr.bf16.mxu0 %v2729_v17  ;;  %2408 = vmatprep.subr.bf16.mxu1 %v2729_v17 }
  0x88   : > { %614 = vadd.xlane.f32.xlu0 %v613_v2  ;;  %v643_v16 = vld [vmem:[%s3286_s4 + $0x10] sm:$0xff]  ;;  %v2403_v18 = vpack.c.bf16 %v642_v15, %v641_v14  ;;  %v644_v19 = vld [vmem:[%s3286_s4 + $0x18] sm:$0xff]  ;;  %v794_v20 = vld [vmem:[%s3284_s2] sm:$0xff]  ;;  %2298 = vmatprep.mubr.msk.f32.mxu0 %vm2730_vm1, %v2731_v23  ;;  %vm725_vm2 = vcmask 64512   ;;  %s2732_s14 = smov 120   ;;  %s2733_s11 = smov 112  }
  0x89   : > { %v795_v21 = vld [vmem:[%s3284_s2 + $0x8] sm:$0xff]  ;;  %2309 = vmatprep.mubr.msk.f32.mxu1 %vm2730_vm1, %v2731_v23  ;;  %v2406_v24 = vpack.c.bf16 %v644_v19, %v643_v16  ;;  %v796_v25 = vld [vmem:[%s3284_s2 + $0x10] sm:$0xff]  ;;  %v797_v26 = vld [vmem:[%s3284_s2 + $0x18] sm:$0xff]  ;;  %s2734_s20 = smov 104   ;;  %s2735_s17 = smov 88   ;;  %vm1990_vm3 = vcmask 523264  }
  0x8a   : > { %v2409_v22 = vpack.c.bf16 %v795_v21, %v794_v20  ;;  %2404 = vmatpush3.bf16.msra.mxu0 %v2403_v18  ;;  %v2412_v27 = vpack.c.bf16 %v797_v26, %v796_v25  ;;  %v2207_v35 = vld [vmem:[%s3290_s8] ss:$0 sm:$0xff]  ;;  %s2736_s15 = smov 96   ;;  %s2737_s30 = smov 80  }
  0x8b   : > { %2405 = vmatprep.subr.bf16.mxu0 %v2729_v17  ;;  %v2208_v37 = vld [vmem:[%s3291_s9] ss:$0 sm:$0xff]  ;;  %s2738_s25 = smov 72   ;;  %s3344_s13 = sld [smem:[#allocation25_spill]] }
  0x8c   : > { %767 = vadd.xlane.f32.xlu0 %v766_v3  ;;  %2410 = vmatpush3.bf16.msra.mxu1 %v2409_v22  ;;  %v2209_v44 = vld [vmem:[%s3287_s5] ss:$0 sm:$0xff]  ;;  %s3347_s27 = sld [smem:[#allocation28_spill]]  ;;  %s3348_s29 = sld [smem:[#allocation22_spill]] }
  0x8d   : > { %2411 = vmatprep.subr.bf16.mxu1 %v2729_v17  ;;  %v2213_v48 = vld [vmem:[%s3285_s3] ss:$0 sm:$0xff]  ;;  %s3349_s18 = sld [smem:[#allocation30_spill]]  ;;  %s604_s24 = scalar_lea.vmem [#allocation11], %s3004_s23 }
  0x8e   : > { %2407 = vmatpush3.bf16.msra.mxu0 %v2406_v24  ;;  %s2067_s0 = scalar_lea.sflag [#allocation7], %s3001_s21  ;;  %s2739_s23 = smov [#allocation11]  }
  0x8f   : > { %2312 = vmatprep.subr.mxu0 %v2731_v23 }
  0x90   : > { %2413 = vmatpush3.bf16.msra.mxu1 %v2412_v27 }
  0x91   : > { %2327 = vmatprep.subr.mxu1 %v2731_v23 }
  0x92   : > { %p3351_p0 = scmp.ne.s32.totalorder %s3348_s29, 0 }
 0x115   : > { %v615_v4 = vpop.xlane.xlu0 %614 }
 0x116   : > { %v617_v5 = vmul.f32 0.03125, %v615_v4 }
 0x118   : > { %v618_v6 = vsub.f32 %v609_v0, %v617_v5 }
 0x119   : > { %v768_v7 = vpop.xlane.xlu0 %767 }
 0x11a   : > { %v770_v8 = vmul.f32 0.03125, %v768_v7  ;;  %v619_v9 = vmul.f32 %v618_v6, %v618_v6 }
 0x11c   : > { %v771_v10 = vsub.f32 %v3022_v1, %v770_v8  ;;  %v620_v11 = vsel %vm612_vm0, %v619_v9, 0.0 }
 0x11d   : > { %621 = vadd.xlane.f32.xlu1 %v620_v11 }
 0x11e   : > { %v772_v12 = vmul.f32 %v771_v10, %v771_v10 }
 0x120   : > { %v773_v13 = vsel %vm612_vm0, %v772_v12, 0.0 }
 0x121   : > { %774 = vadd.xlane.f32.xlu1 %v773_v13 }
 0x1aa   : > { %v622_v28 = vpop.xlane.xlu1 %621 }
 0x1ab   : > { %v623_v29 = vmul.f32 0.03125, %v622_v28 }
 0x1ad   : > { %v624_v30 = vadd.f32 1e-06, %v623_v29 }
 0x1ae   : > { %v775_v31 = vpop.xlane.xlu1 %774 }
 0x1af   : > { %2522 = vrsqrt.f32 %v624_v30  ;;  %v776_v32 = vmul.f32 0.03125, %v775_v31 }
 0x1b1   : > { %v777_v33 = vadd.f32 1e-06, %v776_v32 }
 0x1b3   : > { %2524 = vrsqrt.f32 %v777_v33 }
 0x1b9   : > { %v2523_v34 = vpop.eup %2522 }
 0x1ba   : > { %v626_v36 = vmul.f32 %v2523_v34, %v618_v6 }
 0x1bc   : > { %v633_v38 = vmul.f32 %v2207_v35, %v626_v36 }
 0x1bd   : > { %v2525_v39 = vpop.eup %2524 }
 0x1be   : > { %v640_v40 = vadd.f32 %v2208_v37, %v633_v38  ;;  %v779_v41 = vmul.f32 %v2525_v39, %v771_v10 }
 0x1c0   : > { %2299 = vmatmul.mubr.msk.f32.vlgmr.msra.gmra.mrb[0].mxu0 %vm612_vm0, %v640_v40  ;;  %v786_v42 = vmul.f32 %v2207_v35, %v779_v41 }
 0x1c1   : > { %2314 = vmatprep.mubr.msk.f32.mxu0 %vm2730_vm1, %v2731_v23 }
 0x1c2   : > { %v793_v43 = vadd.f32 %v2208_v37, %v786_v42 }
 0x1c4   : > { %2310 = vmatmul.mubr.msk.f32.vlgmr.msra.gmra.mrb[0].mxu1 %vm612_vm0, %v793_v43 }
 0x1c5   : > { %2329 = vmatprep.mubr.msk.f32.mxu1 %vm2730_vm1, %v2731_v23 }
 0x293   : > { %v721_v45 = vpop.f32.mrb[0].mxu0 }
 0x294   : > { %v3079_v46 = vadd.f32 %v2209_v44, %v721_v45  ;;  %v2300_v47 = vpop.f32.mrb[1].mxu0 }
 0x296   : > { %726 = vst.msk [vmem:[#allocation2] sm:$0xff] %vm725_vm2, %v3079_v46  ;;  %732 = vrot.lane.b32.xlu0 %v3079_v46, %s2732_s14  ;;  %742 = vrot.lane.b32.xlu1 %v3079_v46, %s2733_s11 }
 0x297   : > { %v874_v49 = vpop.f32.mrb[0].mxu1 }
 0x298   : > { %v875_v50 = vadd.f32 %v2213_v48, %v874_v49  ;;  %v2311_v51 = vpop.f32.mrb[1].mxu1 }
 0x29a   : > { %v878_v52 = vmul.f32 0.35355338, %v875_v50 }
 0x29c   : > { %880 = vst.msk [vmem:[#allocation4] sm:$0xff] %vm725_vm2, %v878_v52  ;;  %887 = vrot.lane.b32.xlu0 %v878_v52, %s2733_s11  ;;  %882 = vrot.lane.b32.xlu1 %v878_v52, %s2732_s14  ;;  %s3345_s11 = sld [smem:[#allocation26_spill]]  ;;  %s2081_s14 = sshll.u32 %s604_s24, 4  ;;  %s3234_s14 = int_to_ptr.vmem [resolvable:$true] %s2081_s14 }
 0x29d   : > { %v901_v53 = vld [vmem:[#allocation2] sm:$0xff]  ;;  %s2632_s28 = scalar_lea.vmem %s3234_s14, 128 }
 0x29e   : > { %2313 = vmatpush3.xpose.msk.msra.mxu0 %vm725_vm2, %v901_v53  ;;  %p2633_p12 = scmp.ne.s32.totalorder %s3234_s14, %s2632_s28 }
 0x29f   : > { %2317 = vmatprep.subr.mxu0 %v2731_v23 }
 0x2a0   : > { %752 = vrot.lane.b32.xlu1 %v3079_v46, %s2734_s20  ;;  %p2634_p5 = pnand %p2633_p12, %p3351_p0 }
 0x2a2   : > { %p2635_p9 = pneg %p2634_p5 }
 0x2a3   : > { %v897_v54 = vld [vmem:[#allocation4] sm:$0xff] }
 0x2a4   : > { %892 = vrot.lane.b32.xlu1 %v878_v52, %s2734_s20  ;;  %2315 = vmatmul.mubr.msk.f32.vlgmr.msra.gmra.mrb[2].mxu0 %vm725_vm2, %v897_v54  ;;  %s3343_s20 = sld [smem:[#allocation29_spill]] }
 0x2a5   : > { %2319 = vmatprep.mubr.msk.f32.mxu0 %vm2730_vm1, %v2731_v23 }
 0x308   : > { %v743_v55 = vpop.permute.xlu1 %742  ;;  %v733_v56 = vpop.permute.xlu0 %732 }
 0x309   : > { %746 = vst.msk [vmem:[#allocation2 + $0x10] sm:$0xff] %vm725_vm2, %v743_v55  ;;  %736 = vst.msk [vmem:[#allocation2 + $0x8] sm:$0xff] %vm725_vm2, %v733_v56 }
 0x30e   : > { %v883_v57 = vpop.permute.xlu1 %882  ;;  %v888_v58 = vpop.permute.xlu0 %887 }
 0x30f   : > { %886 = vst.msk [vmem:[#allocation4 + $0x8] sm:$0xff] %vm725_vm2, %v883_v57  ;;  %891 = vst.msk [vmem:[#allocation4 + $0x10] sm:$0xff] %vm725_vm2, %v888_v58  ;;  %v1549_v58 = vld [vmem:[%s3288_s6] sm:$0xff] }
 0x310   : > { %v902_v59 = vld [vmem:[#allocation2 + $0x8] sm:$0xff]  ;;  %v903_v63 = vld [vmem:[#allocation2 + $0x10] sm:$0xff] }
 0x311   : > { %2318 = vmatpush3.xpose.msk.msra.mxu0 %vm725_vm2, %v902_v59  ;;  %v1550_v59 = vld [vmem:[%s3288_s6 + $0x8] sm:$0xff] }
 0x312   : > { %v753_v60 = vpop.permute.xlu1 %752  ;;  %2322 = vmatprep.subr.mxu0 %v2731_v23 }
 0x313   : > { %756 = vst.msk [vmem:[#allocation2 + $0x18] sm:$0xff] %vm725_vm2, %v753_v60  ;;  %v1551_v60 = vld [vmem:[%s3288_s6 + $0x10] sm:$0xff] }
 0x316   : > { %v893_v61 = vpop.permute.xlu1 %892  ;;  %v898_v62 = vld [vmem:[#allocation4 + $0x8] sm:$0xff]  ;;  %v899_v0 = vld [vmem:[#allocation4 + $0x10] sm:$0xff] }
 0x317   : > { %896 = vst.msk [vmem:[#allocation4 + $0x18] sm:$0xff] %vm725_vm2, %v893_v61  ;;  %2320 = vmatmul.mubr.msk.f32.vlgmr.msra.gmra.mrb[4].mxu0 %vm725_vm2, %v898_v62 }
 0x318   : > { %2323 = vmatpush3.xpose.msk.msra.mxu0 %vm725_vm2, %v903_v63  ;;  %2324 = vmatprep.mubr.msk.f32.mxu0 %vm2730_vm1, %v2731_v23  ;;  %v1552_v63 = vld [vmem:[%s3288_s6 + $0x18] sm:$0xff] }
 0x319   : > { %2332 = vmatprep.subr.mxu0 %v2731_v23 }
 0x31a   : > { %v904_v2 = vld [vmem:[#allocation2 + $0x18] sm:$0xff] }
 0x31b   : > { %2325 = vmatmul.mubr.msk.f32.vlgmr.msra.gmra.mrb[6].mxu0 %vm725_vm2, %v899_v0  ;;  %2328 = vmatpush3.xpose.msk.msra.mxu1 %vm725_vm2, %v904_v2 }
 0x31c   : > { %2334 = vmatprep.mubr.msk.f32.mxu0 %vm2730_vm1, %v2731_v23  ;;  %2337 = vmatprep.subr.mxu1 %v2731_v23 }
 0x31e   : > { %v900_v3 = vld [vmem:[#allocation4 + $0x18] sm:$0xff] }
 0x31f   : > { %2330 = vmatmul.mubr.msk.f32.vlgmr.msra.gmra.mrb[2].mxu1 %vm725_vm2, %v900_v3 }
 0x320   : > { %2339 = vmatprep.mubr.msk.f32.mxu1 %vm2730_vm1, %v2731_v23 }
 0x377   : > { %v977_v4 = vpop.f32.mrb[2].mxu0 }
 0x378   : > { %v2316_v5 = vpop.f32.mrb[3].mxu0  ;;  %v1209_v6 = vsel %vm725_vm2, %v977_v4, -inf }
 0x379   : > { %1210 = vmax.xlane.f32.xlu0 %v1209_v6 }
 0x3ea   : > { %v1053_v7 = vpop.f32.mrb[4].mxu0 }
 0x3eb   : > { %v2321_v8 = vpop.f32.mrb[5].mxu0  ;;  %v1212_v9 = vsel %vm725_vm2, %v1053_v7, -inf }
 0x3ec   : > { %1213 = vmax.xlane.f32.xlu1 %v1212_v9 }
 0x3ee   : > { %v1129_v10 = vpop.f32.mrb[6].mxu0 }
 0x3ef   : > { %v2326_v11 = vpop.f32.mrb[7].mxu0  ;;  %v1215_v12 = vsel %vm725_vm2, %v1129_v10, -inf }
 0x3f0   : > { %1216 = vmax.xlane.f32.xlu0 %v1215_v12 }
 0x3f2   : > { %v1205_v13 = vpop.f32.mrb[2].mxu1 }
 0x3f3   : > { %v2331_v14 = vpop.f32.mrb[3].mxu1  ;;  %v1218_v15 = vsel %vm725_vm2, %v1205_v13, -inf }
 0x3f4   : > { %1219 = vmax.xlane.f32.xlu0 %v1218_v15 }
 0x406   : > { %v1211_v16 = vpop.xlane.xlu0 %1210 }
 0x407   : > { %v1221_v18 = vsub.f32 %v977_v4, %v1211_v16 }
 0x409   : > { %v1225_v19 = vmul.f32 1.442695, %v1221_v18 }
 0x40b   : > { %2526 = vpow2.f32 %v1225_v19 }
 0x415   : > { %v2527_v20 = vpop.eup %2526 }
 0x416   : > { %v1233_v21 = vsel %vm725_vm2, %v2527_v20, 0.0 }
 0x417   : > { %1234 = vadd.xlane.f32.xlu0 %v1233_v21 }
 0x479   : > { %v1214_v22 = vpop.xlane.xlu1 %1213 }
 0x47a   : > { %v1222_v24 = vsub.f32 %v1053_v7, %v1214_v22 }
 0x47c   : > { %v1227_v25 = vmul.f32 1.442695, %v1222_v24 }
 0x47d   : > { %v1217_v26 = vpop.xlane.xlu0 %1216 }
 0x47e   : > { %2528 = vpow2.f32 %v1227_v25  ;;  %v1223_v27 = vsub.f32 %v1129_v10, %v1217_v26 }
 0x480   : > { %v1229_v28 = vmul.f32 1.442695, %v1223_v27 }
 0x481   : > { %v1220_v29 = vpop.xlane.xlu0 %1219 }
 0x482   : > { %2530 = vpow2.f32 %v1229_v28  ;;  %v1224_v30 = vsub.f32 %v1205_v13, %v1220_v29 }
 0x484   : > { %v1231_v31 = vmul.f32 1.442695, %v1224_v30 }
 0x486   : > { %2532 = vpow2.f32 %v1231_v31 }
 0x488   : > { %v2529_v32 = vpop.eup %2528 }
 0x489   : > { %v1236_v33 = vsel %vm725_vm2, %v2529_v32, 0.0 }
 0x48a   : > { %1237 = vadd.xlane.f32.xlu1 %v1236_v33  ;;  %v1891_v33 = vld [vmem:[#allocation10 + $0x8] sm:$0xff] }
 0x48c   : > { %v2531_v34 = vpop.eup %2530 }
 0x48d   : > { %v1239_v35 = vsel %vm725_vm2, %v2531_v34, 0.0 }
 0x48e   : > { %1240 = vadd.xlane.f32.xlu0 %v1239_v35  ;;  %v1892_v35 = vld [vmem:[#allocation10 + $0x10] sm:$0xff] }
 0x490   : > { %v2533_v36 = vpop.eup %2532 }
 0x491   : > { %v1242_v37 = vsel %vm725_vm2, %v2533_v36, 0.0 }
 0x492   : > { %1243 = vadd.xlane.f32.xlu1 %v1242_v37 }
 0x4a3   : > { %737 = vrot.lane.b32.xlu1 %v3079_v46, %s2735_s17  ;;  %s3346_s17 = sld [smem:[#allocation18_spill]] }
 0x4a4   : > { %728 = vrot.lane.b32.xlu0 %v3079_v46, %s2736_s15  ;;  %v1235_v38 = vpop.xlane.xlu0 %1234 }
 0x4a5   : > { %2534 = vrcp.f32 %v1235_v38  ;;  %v1976_v38 = vld [vmem:[%s3343_s20 + $0x8] sm:$0xff] }
 0x4a7   : > { %747 = vrot.lane.b32.xlu1 %v3079_v46, %s2737_s30  ;;  %s3350_s30 = sld [smem:[#allocation31_spill]] }
 0x4ab   : > { %757 = vrot.lane.b32.xlu1 %v3079_v46, %s2738_s25 }
 0x4af   : > { %v2535_v44 = vpop.eup %2534 }
 0x4b0   : > { %v1249_v45 = vmul.f32 %v2535_v44, %v2527_v20  ;;  %v1980_v44 = vld [vmem:[%s3343_s20 + $0x28] sm:$0xff] }
 0x517   : > { %v1238_v39 = vpop.xlane.xlu1 %1237 }
 0x518   : > { %2536 = vrcp.f32 %v1238_v39  ;;  %v1977_v39 = vld [vmem:[%s3343_s20 + $0x10] sm:$0xff] }
 0x51b   : > { %v1241_v40 = vpop.xlane.xlu0 %1240 }
 0x51c   : > { %2538 = vrcp.f32 %v1241_v40 }
 0x51f   : > { %v1244_v41 = vpop.xlane.xlu1 %1243  ;;  %v729_v42 = vpop.permute.xlu0 %728 }
 0x520   : > { %731 = vst.msk [vmem:[#allocation3] sm:$0xff] %vm725_vm2, %v729_v42  ;;  %2540 = vrcp.f32 %v1244_v41  ;;  %v1978_v41 = vld [vmem:[%s3343_s20 + $0x18] sm:$0xff] }
 0x521   : > { %v2424_v42 = vpack.c.bf16 %v1978_v41, %v1977_v39 }
 0x522   : > { %v2537_v49 = vpop.eup %2536 }
 0x523   : > { %v738_v43 = vpop.permute.xlu1 %737  ;;  %v1250_v46 = vmul.f32 %v2537_v49, %v2529_v32  ;;  %v1890_v32 = vld [vmem:[#allocation10] sm:$0xff] }
 0x524   : > { %741 = vst.msk [vmem:[#allocation3 + $0x8] sm:$0xff] %vm725_vm2, %v738_v43  ;;  %v1979_v43 = vld [vmem:[%s3343_s20 + $0x20] sm:$0xff] }
 0x526   : > { %v2539_v52 = vpop.eup %2538 }
 0x527   : > { %v748_v47 = vpop.permute.xlu1 %747  ;;  %v1253_v48 = vld [vmem:[#allocation3] sm:$0xff]  ;;  %v1251_v53 = vmul.f32 %v2539_v52, %v2531_v34  ;;  %v2415_v34 = vpack.c.bf16 %v1891_v33, %v1890_v32 }
 0x528   : > { %751 = vst.msk [vmem:[#allocation3 + $0x10] sm:$0xff] %vm725_vm2, %v748_v47  ;;  %2333 = vmatpush3.msra.mxu0 %v1253_v48  ;;  %v2233_v52 = vld [vmem:[%s3345_s11] ss:$0 sm:$0xff] }
 0x529   : > { %2335 = vmatmul.mubr.msk.f32.vlgmr.msra.gmra.mrb[8].mxu0 %vm725_vm2, %v1249_v45  ;;  %2342 = vmatprep.subr.mxu0 %v2731_v23  ;;  %v2427_v45 = vpack.c.bf16 %v1980_v44, %v1979_v43 }
 0x52a   : > { %2344 = vmatprep.mubr.msk.f32.mxu0 %vm2730_vm1, %v2731_v23  ;;  %v2541_v55 = vpop.eup %2540 }
 0x52b   : > { %v758_v50 = vpop.permute.xlu1 %757  ;;  %v1254_v51 = vld [vmem:[#allocation3 + $0x8] sm:$0xff]  ;;  %v1252_v56 = vmul.f32 %v2541_v55, %v2533_v36  ;;  %v1893_v36 = vld [vmem:[#allocation10 + $0x18] sm:$0xff] }
 0x52c   : > { %761 = vst.msk [vmem:[#allocation3 + $0x18] sm:$0xff] %vm725_vm2, %v758_v50  ;;  %2338 = vmatpush3.msra.mxu1 %v1254_v51  ;;  %v2418_v37 = vpack.c.bf16 %v1893_v36, %v1892_v35  ;;  %v2232_v50 = vld [vmem:[%s3344_s13] ss:$0 sm:$0xff]  ;;  %v1982_v55 = vld [vmem:[%s3343_s20 + $0x38] sm:$0xff]  ;;  %s2239_s13 = sshll.u32 %s3346_s17, 7  ;;  %s2636_s17 = sshll.u32 %s2739_s23, 4  ;;  %s2637_s17 = int_to_ptr.vmem [resolvable:$false] %s2636_s17 }
 0x52d   : > { %2340 = vmatmul.mubr.msk.f32.vlgmr.msra.gmra.mrb[4].mxu1 %vm725_vm2, %v1250_v46  ;;  %2347 = vmatprep.subr.mxu1 %v2731_v23  ;;  %s3232_s25 = scalar_lea.hbm %s3350_s30, %s2239_s13  ;;  %s2638_s16 = scalar_lea.vmem %s2637_s17, 256 }
 0x52e   : > { %2349 = vmatprep.mubr.msk.f32.mxu1 %vm2730_vm1, %v2731_v23  ;;  %p2639_p1 = scmp.lt.s32.totalorder %s3234_s14, %s2637_s17  ;;  %p2640_p2 = scmp.lt.s32.totalorder %s2638_s16, %s2632_s28 }
 0x52f   : > { %v1255_v54 = vld [vmem:[#allocation3 + $0x10] sm:$0xff] }
 0x530   : > { %2343 = vmatpush3.msra.mxu0 %v1255_v54  ;;  %p2641_p7 = por %p2640_p2, %p2639_p1 }
 0x531   : > { %2345 = vmatmul.mubr.msk.f32.vlgmr.msra.gmra.mrb[10].mxu0 %vm725_vm2, %v1251_v53  ;;  %2352 = vmatprep.subr.mxu0 %v2731_v23 }
 0x532   : > { %2354 = vmatprep.mubr.msk.f32.mxu0 %vm2730_vm1, %v2731_v23  ;;  %2353 = vmatpush3.msra.mxu0 %v1549_v58  ;;  %p2642_p4 = pnand %p2641_p7, %p2635_p9 }
 0x533   : > { %v1256_v57 = vld [vmem:[#allocation3 + $0x18] sm:$0xff]  ;;  %2362 = vmatprep.subr.mxu0 %v2731_v23 }
 0x534   : > { %2348 = vmatpush3.msra.mxu1 %v1256_v57  ;;  %v2234_v57 = vld [vmem:[%s3347_s27] ss:$0 sm:$0xff] }
 0x535   : > { %2350 = vmatmul.mubr.msk.f32.vlgmr.msra.gmra.mrb[6].mxu1 %vm725_vm2, %v1252_v56  ;;  %2357 = vmatprep.subr.mxu1 %v2731_v23 }
 0x536   : > { %2359 = vmatprep.mubr.msk.f32.mxu1 %vm2730_vm1, %v2731_v23  ;;  %2358 = vmatpush3.msra.mxu1 %v1550_v59 }
 0x537   : > { %2367 = vmatprep.subr.mxu1 %v2731_v23 }
 0x5fc   : > { %v1326_v61 = vpop.f32.mrb[8].mxu0 }
 0x5fd   : > { %v2336_v62 = vpop.f32.mrb[9].mxu0  ;;  %2355 = vmatmul.mubr.msk.f32.vlgmr.msra.gmra.mrb[12].mxu0 %vm725_vm2, %v1326_v61 }
 0x5fe   : > { %2363 = vmatpush3.msra.mxu0 %v1551_v60  ;;  %2364 = vmatprep.mubr.msk.f32.mxu0 %vm2730_vm1, %v2731_v23  ;;  %v2236_v62 = vld [vmem:[%s3349_s18] ss:$0 sm:$0xff] }
 0x5ff   : > { %2414 = vmatprep.subr.bf16.mxu0 %v2729_v17 }
 0x600   : > { %v1399_v0 = vpop.f32.mrb[4].mxu1 }
 0x601   : > { %v2341_v2 = vpop.f32.mrb[5].mxu1  ;;  %2360 = vmatmul.mubr.msk.f32.vlgmr.msra.gmra.mrb[8].mxu1 %vm725_vm2, %v1399_v0 }
 0x602   : > { %2368 = vmatpush3.msra.mxu1 %v1552_v63  ;;  %2369 = vmatprep.mubr.msk.f32.mxu1 %vm2730_vm1, %v2731_v23 }
 0x603   : > { %2420 = vmatprep.subr.bf16.mxu1 %v2729_v17 }
 0x604   : > { %v1472_v3 = vpop.f32.mrb[10].mxu0 }
 0x605   : > { %v2346_v4 = vpop.f32.mrb[11].mxu0  ;;  %2365 = vmatmul.mubr.msk.f32.vlgmr.msra.gmra.mrb[14].mxu0 %vm725_vm2, %v1472_v3 }
 0x606   : > { %2380 = vmatprep.mubr.msk.f32.mxu0 %vm2730_vm1, %v2731_v23  ;;  %2416 = vmatpush3.bf16.msra.mxu0 %v2415_v34 }
 0x607   : > { %2417 = vmatprep.subr.bf16.mxu0 %v2729_v17 }
 0x608   : > { %v1545_v5 = vpop.f32.mrb[6].mxu1 }
 0x609   : > { %v2351_v6 = vpop.f32.mrb[7].mxu1  ;;  %2370 = vmatmul.mubr.msk.f32.vlgmr.msra.gmra.mrb[10].mxu1 %vm725_vm2, %v1545_v5 }
 0x60a   : > { %2399 = vmatprep.mubr.msk.f32.mxu1 %vm2730_vm1, %v2731_v23  ;;  %v2231_v23 = vld [vmem:[%s3289_s7] ss:$0 sm:$0xff]  ;;  %2419 = vmatpush3.bf16.msra.mxu0 %v2418_v37 }
 0x6d0   : > { %v1622_v7 = vpop.f32.mrb[12].mxu0 }
 0x6d1   : > { %v2356_v8 = vpop.f32.mrb[13].mxu0  ;;  %v1845_v10 = vsel %vm612_vm0, %v1622_v7, 0.0 }
 0x6d4   : > { %v1695_v9 = vpop.f32.mrb[8].mxu1 }
 0x6d5   : > { %v1846_v11 = vsel %vm612_vm0, %v1695_v9, 0.0  ;;  %v2361_v12 = vpop.f32.mrb[9].mxu1 }
 0x6d6   : > { %v1847_v13 = vadd.f32 %v1846_v11, %v1845_v10 }
 0x6d8   : > { %v1768_v14 = vpop.f32.mrb[14].mxu0 }
 0x6d9   : > { %v1848_v15 = vsel %vm612_vm0, %v1768_v14, 0.0  ;;  %v2366_v16 = vpop.f32.mrb[15].mxu0 }
 0x6da   : > { %v1849_v18 = vadd.f32 %v1848_v15, %v1847_v13 }
 0x6dc   : > { %v1841_v19 = vpop.f32.mrb[10].mxu1 }
 0x6dd   : > { %v1850_v20 = vsel %vm612_vm0, %v1841_v19, 0.0  ;;  %v2371_v21 = vpop.f32.mrb[11].mxu1 }
 0x6de   : > { %v1851_v22 = vadd.f32 %v1850_v20, %v1849_v18 }
 0x6e0   : > { %v1859_v24 = vadd.f32 %v2231_v23, %v1851_v22 }
 0x6e2   : > { %v1860_v25 = vadd.f32 %v1859_v24, %v3022_v1  ;;  %v1975_v1 = vld [vmem:[%s3343_s20] sm:$0xff] }
 0x6e3   : > { %v2421_v40 = vpack.c.bf16 %v1976_v38, %v1975_v1 }
 0x6e4   : > { %v1863_v26 = vsel %vm612_vm0, %v1860_v25, 0.0 }
 0x6e5   : > { %1864 = vadd.xlane.f32.xlu0 %v1863_v26  ;;  %2422 = vmatpush3.bf16.msra.mxu1 %v2421_v40 }
 0x6e6   : > { %2423 = vmatprep.subr.bf16.mxu1 %v2729_v17 }
 0x6e9   : > { %2425 = vmatpush3.bf16.msra.mxu1 %v2424_v42 }
 0x6ea   : > { %2426 = vmatprep.subr.bf16.mxu1 %v2729_v17 }
 0x6ed   : > { %2428 = vmatpush3.bf16.msra.mxu1 %v2427_v45 }
 0x6ee   : > { %2429 = vmatprep.subr.bf16.mxu1 %v2729_v17  ;;  %v1981_v17 = vld [vmem:[%s3343_s20 + $0x30] sm:$0xff] }
 0x6ef   : > { %v2430_v56 = vpack.c.bf16 %v1982_v55, %v1981_v17 }
 0x6f1   : > { %2431 = vmatpush3.bf16.msra.mxu1 %v2430_v56 }
 0x772   : > { %v1865_v27 = vpop.xlane.xlu0 %1864 }
 0x773   : > { %v1866_v28 = vmul.f32 0.03125, %v1865_v27 }
 0x775   : > { %v1867_v29 = vsub.f32 %v1860_v25, %v1866_v28 }
 0x777   : > { %v1868_v30 = vmul.f32 %v1867_v29, %v1867_v29 }
 0x779   : > { %v1869_v31 = vsel %vm612_vm0, %v1868_v30, 0.0 }
 0x77a   : > { %1870 = vadd.xlane.f32.xlu1 %v1869_v31 }
 0x807   : > { %v1871_v47 = vpop.xlane.xlu1 %1870 }
 0x808   : > { %v1872_v48 = vmul.f32 0.03125, %v1871_v47 }
 0x80a   : > { %v1873_v49 = vadd.f32 1e-06, %v1872_v48 }
 0x80c   : > { %2542 = vrsqrt.f32 %v1873_v49 }
 0x816   : > { %v2543_v46 = vpop.eup %2542 }
 0x817   : > { %v1875_v51 = vmul.f32 %v2543_v46, %v1867_v29 }
 0x819   : > { %v1882_v53 = vmul.f32 %v2232_v50, %v1875_v51 }
 0x81b   : > { %v1889_v54 = vadd.f32 %v2233_v52, %v1882_v53 }
 0x81d   : > { %2381 = vmatmul.mubr.msk.f32.vlgmr.msra.gmra.mrb[16].mxu0 %vm612_vm0, %v1889_v54 }
 0x8f0   : > { %v1970_v58 = vpop.f32.mrb[16].mxu0 }
 0x8f1   : > { %v1971_v59 = vadd.f32 %v2234_v57, %v1970_v58  ;;  %v2382_v60 = vpop.f32.mrb[17].mxu0 }
 0x8f3   : > { %v1974_v61 = vmax.f32 %v1971_v59, 0.0 }
 0x8f5   : > { %2400 = vmatmul.mubr.msk.f32.vlgmr.msra.gmra.mrb[12].mxu1 %vm1990_vm3, %v1974_v61 }
 0x9c8   : > { %v2060_v63 = vpop.f32.mrb[12].mxu1 }
 0x9c9   : > { %v2061_v0 = vadd.f32 %v2236_v62, %v2060_v63  ;;  %v2401_v2 = vpop.f32.mrb[13].mxu1 }
 0x9cb   : > { %v2064_v3 = vadd.f32 %v2061_v0, %v1860_v25 }
 0x9cd   : > { %2065 = vst.msk [vmem:[%s604_s24] sm:$0xff] %vm612_vm0, %v2064_v3 }
 0x9ce   : > { %2645 = shalt.err (!%p2642_p4)
}
 0x9cf   : > { %s2646_s21 = scalar_lea.hbm %s3232_s25, 128  ;;  %s2650_s10 = scalar_lea.hbm %s3350_s30, 256 }
 0x9d0   : > { %p2647_p8 = scmp.ne.s32.totalorder %s3232_s25, %s2646_s21  ;;  %p2651_p10 = scmp.lt.u32.totalorder %s3232_s25, %s3350_s30 }
 0x9d1   : > { %p2652_p13 = scmp.lt.u32.totalorder %s2650_s10, %s2646_s21  ;;  %p2654_p12 = scmp.lt.u32.totalorder %s2646_s21, %s3232_s25 }
 0x9d2   : > { %p2648_p11 = pnand %p2647_p8, %p3351_p0 }
 0x9d3   : > { %p2653_p3 = por %p2652_p13, %p2651_p10 }
 0x9d4   : > { %p2649_p6 = pneg %p2648_p11 }
 0x9d5   : > { %p2655_p5 = por %p2654_p12, %p2653_p3 }
 0x9d7   : > { %p2656_p9 = pnand %p2655_p5, %p2649_p6 }
 0x9d9   : > { %2659 = shalt.err (!%p2656_p9)
}
 0x9da   : > { %2440 = dma.vmem_to_hbm [thread:$0]  (%p3351_p0), %s3234_s14, 128, %s3232_s25, %s2067_s0  }
 0x9db PF: > { %s3352_s24 = sld [smem:[#allocation16_spill]]  ;;  %s3353_s11 = sld [smem:[#allocation20_spill]] }
 0x9dc   : > { %p3355_p2 = scmp.ge.s32.totalorder %s2722_s26, 2 }
 0x9e1   : > { %s2093_s15 = sand.u32 1, %s3352_s24   ;;  %p3354_p1 = scmp.ne.s32.totalorder %s3353_s11, 0 }
 0x9e2   : > { %s2094_s28 = scalar_lea.sflag [#allocation7], %s2093_s15 }
 0x9e3   : > { %p2454_p7 = pnand %p3355_p2, %p3354_p1 }
 0x9e5   : > { %2697 = dma.done.wait (!%p2454_p7), %s2094_s28, 128  }
 0x9e6   : > { %2699 = vsyncadd (!%p2454_p7), %s2094_s28, 4294967168  ;;  %s35_s26 = sadd.s32 1, %s2722_s26   ;;  %s3356_s23 = sld [smem:[#allocation17_spill]] }
 0x9e7   : > { %p32_p4 = scmp.ge.s32.totalorder %s35_s26, 4   ;;  %s3357_s29 = sld [smem:[#allocation23_spill]] }
 0x9e8   : > { %s3358_s24 = sld [smem:[#allocation19_spill]]  ;;  %s3359_s25 = sld [smem:[#allocation21_spill]] }
 0x9e9   : > { %s3360_s21 = smov %s2706_s22  ;;  %34 = sbr.rel (!%p32_p4) target bundleno = 17 (0x11), region = 159 }
 0x9ec   : > { %s3361_s22 = smov %s3356_s23 }
 0x9ed   : > { %s3362_s23 = smov %s3357_s29 }
 0x9f0   :  { %2099 = vsyncpa [#allocation6], 1 }
 0x9f1   :  { %2101 = vsyncpa [#allocation6 + $0x1], 1 }
 0x9f2   :  { %2102 = vsyncpa [#allocation9], 1 }
 0x9f3   :  { %2104 = vsyncpa [#allocation9 + $0x1], 1 }
 0x9f4   :  { %2105 = vsyncpa [#allocation7], 1 }
 0x9f5   :  { %2107 = vsyncpa [#allocation7 + $0x1], 1 }

</bundles_post_ra>
